<compile_context>
chip_gen: v7x
topology: tpu7x:2x2x1
jax: 0.10.0
libtpu: 0.0.40
codegen_flags: <defaults>
</compile_context>

<pallas_src>
import functools
import math

import jax
import jax.numpy as jnp
import numpy as np
from jax.experimental import pallas as pl
from jax.experimental.pallas import tpu as pltpu


def _layernorm(x, gamma, beta, eps=1e-5):
    # fp32 layernorm (matches the fp16-safe LayerNorm subclass)
    mu = jnp.mean(x, axis=-1, keepdims=True)
    var = jnp.mean(jnp.square(x - mu), axis=-1, keepdims=True)
    return (x - mu) * jax.lax.rsqrt(var + eps) * gamma + beta


def _quick_gelu(x):
    return x * jax.nn.sigmoid(1.702 * x)


def residual_attention_block_kernel(
    x_ref,                       # (L, D)   f32  full sequence for this batch element
    ln1_g_ref, ln1_b_ref,        # (1, D)   f32
    wqkv_ref, bqkv_ref,          # (D, 3D)  bf16 (pre-transposed, q-scale folded), (1, 3D) f32
    wo_ref, bo_ref,              # (D, D)   bf16 (pre-transposed), (1, D) f32
    ln2_g_ref, ln2_b_ref,        # (1, D)   f32
    wfc_ref, bfc_ref,            # (D, 4D)  bf16, (1, 4D) f32
    wproj_ref, bproj_ref,        # (4D, D)  bf16, (1, D) f32
    o_ref,                       # (TQ, D)  f32  this query tile
    *, d_model, n_head, q_tile,
):
    D, H = d_model, n_head
    hd = D // H
    L = x_ref.shape[0]
    TQ = q_tile
    q0 = pl.multiple_of(pl.program_id(1) * TQ, TQ)

    x_q = x_ref[pl.ds(q0, TQ), :]                               # (TQ, D) f32 residual rows

    # ---------------- attention branch ----------------
    # K/V need the whole sequence; Q only this tile's rows (row-wise LN is independent).
    xn_full = _layernorm(x_ref[...], ln1_g_ref[0], ln1_b_ref[0]).astype(jnp.bfloat16)
    xn_q = _layernorm(x_q, ln1_g_ref[0], ln1_b_ref[0]).astype(jnp.bfloat16)

    wqkv = wqkv_ref[...]                                        # (D, 3D) bf16
    b_qkv = bqkv_ref[0]                                         # (3D,)   f32
    kv = jnp.dot(xn_full, wqkv[:, D:],
                 preferred_element_type=jnp.float32) + b_qkv[D:]          # (L, 2D) f32
    q = jnp.dot(xn_q, wqkv[:, :D],
                preferred_element_type=jnp.float32) + b_qkv[:D]           # (TQ, D) f32

    def heads(t, rows):                                         # (rows, D) f32 -> (H, rows, hd) bf16
        return jnp.transpose(t.reshape(rows, H, hd).astype(jnp.bfloat16), (1, 0, 2))

    qh = heads(q, TQ)            # q-scale already folded into wqkv / bqkv
    kh = heads(kv[:, :D], L)
    vh = heads(kv[:, D:], L)

    # fused softmax: one (H, TQ, L) f32 buffer (s reused through exp) + bf16 probs
    s = jnp.einsum('hqe,hke->hqk', qh, kh, preferred_element_type=jnp.float32)
    s = jnp.exp(s - jnp.max(s, axis=-1, keepdims=True))
    p = (s * pl.reciprocal(jnp.sum(s, axis=-1, keepdims=True),
                           approx=True)).astype(jnp.bfloat16)
    ctx = jnp.einsum('hqk,hke->hqe', p, vh,
                     preferred_element_type=jnp.float32)                  # (H, TQ, hd) f32

    # merge heads (bf16 relayout) and apply the pre-transposed out projection
    ctx_flat = jnp.transpose(ctx.astype(jnp.bfloat16), (1, 0, 2)).reshape(TQ, D)
    attn_out = jnp.dot(ctx_flat, wo_ref[...],
                       preferred_element_type=jnp.float32) + bo_ref[0]
    xr = x_q + attn_out                                                   # (TQ, D) f32

    # ---------------- MLP branch ----------------
    xn2 = _layernorm(xr, ln2_g_ref[0], ln2_b_ref[0]).astype(jnp.bfloat16)
    h = jnp.dot(xn2, wfc_ref[...],
                preferred_element_type=jnp.float32) + bfc_ref[0]          # (TQ, 4D) f32
    h = _quick_gelu(h).astype(jnp.bfloat16)
    y = jnp.dot(h, wproj_ref[...],
                preferred_element_type=jnp.float32) + bproj_ref[0]
    o_ref[...] = xr + y


def prepare_params(params, n_head):
    """One-time weight prep (transpose, q-scale fold, bf16 cast).

    Call ONCE at model init (or under a jit that constant-folds it) -- not per forward.
    `params` is in PyTorch nn.Linear layout (weight: (out, in), y = x @ W.T + b)."""
    D = params["wo"].shape[0]
    hd = D // n_head
    scale = 1.0 / math.sqrt(hd)
    qscale = jnp.concatenate([jnp.full((D,), scale, jnp.float32),
                              jnp.ones((2 * D,), jnp.float32)])
    return {
        "ln1_g": params["ln1_g"].astype(jnp.float32),
        "ln1_b": params["ln1_b"].astype(jnp.float32),
        "wqkv_t": (params["wqkv"] * qscale[:, None]).T.astype(jnp.bfloat16),   # (D, 3D)
        "bqkv_s": (params["bqkv"] * qscale[None, :]).astype(jnp.float32),      # (1, 3D)
        "wo_t": params["wo"].T.astype(jnp.bfloat16),                           # (D, D)
        "bo": params["bo"].astype(jnp.float32),
        "ln2_g": params["ln2_g"].astype(jnp.float32),
        "ln2_b": params["ln2_b"].astype(jnp.float32),
        "wfc_t": params["wfc"].T.astype(jnp.bfloat16),                         # (D, 4D)
        "bfc": params["bfc"].astype(jnp.float32),
        "wproj_t": params["wproj"].T.astype(jnp.bfloat16),                     # (4D, D)
        "bproj": params["bproj"].astype(jnp.float32),
    }


def _pick_q_tile(L):
    # Query-tile size: multiple of 8, divides L; falls back to the whole sequence
    # (CLIP's L = 50 / 197 / 257 aren't tileable without padding).
    for tq in (256, 128):
        if L > tq and L % tq == 0:
            return tq
    return L


def residual_attention_block(x_lnd, prepped, n_head, q_tile=None):
    """x_lnd: (L, N, D) float32, PyTorch (seq, batch, d_model) convention.
    `prepped` comes from prepare_params() (already transposed / scaled / bf16)."""
    L, N, D = x_lnd.shape
    H = n_head
    TQ = q_tile if q_tile is not None else _pick_q_tile(L)
    assert L % TQ == 0 and D % H == 0
    n_q = L // TQ

    # layout plumbing (see TODO at top: hoist across the layer stack in a real model)
    x = jnp.transpose(x_lnd, (1, 0, 2))                 # (N, L, D) batch-major

    param_vals = [
        prepped["ln1_g"], prepped["ln1_b"],
        prepped["wqkv_t"], prepped["bqkv_s"],
        prepped["wo_t"], prepped["bo"],
        prepped["ln2_g"], prepped["ln2_b"],
        prepped["wfc_t"], prepped["bfc"],
        prepped["wproj_t"], prepped["bproj"],
    ]

    # ---- VMEM budget: single-buffered weights + pipelined activation blocks ----
    param_bytes = sum(int(p.size) * p.dtype.itemsize for p in param_vals)
    act_bytes = (2 * L * D * 4             # double-buffered x block
                 + 2 * TQ * D * 4          # double-buffered out block
                 + L * 3 * D * (4 + 2)     # q/kv f32 + bf16 head splits
                 + H * TQ * L * (4 + 2)    # scores f32 + probs bf16
                 + TQ * D * (4 + 2)        # ctx
                 + TQ * 4 * D * (4 + 2)    # MLP hidden f32 + bf16
                 + 6 * L * D * 4)          # LN temps / residual / slack
    try:
        cap = int(0.85 * pltpu.get_tpu_info().vmem_capacity_bytes)   # ~54 MiB v7x, ~109 MiB v5e/v6e
    except Exception:
        cap = 96 * 2**20
    vmem_limit = int(min(cap, max(16 * 2**20, param_bytes + act_bytes + (2 << 20))))

    # x: full sequence per batch element; constant across the query-tile axis, so it is
    # only DMA'd when the batch index changes.
    x_spec = pl.BlockSpec((None, L, D), lambda b, qi: (b, 0, 0))
    # weights/biases/LN params: grid-invariant -> single VMEM buffer (no double-buffering)
    w_specs = [pl.BlockSpec(p.shape, lambda b, qi: (0, 0), pipeline_mode=pl.Buffered(1))
               for p in param_vals]
    out_spec = pl.BlockSpec((None, TQ, D), lambda b, qi: (b, qi, 0))

    kernel = functools.partial(residual_attention_block_kernel,
                               d_model=D, n_head=H, q_tile=TQ)

    out = pl.pallas_call(
        kernel,
        out_shape=jax.ShapeDtypeStruct((N, L, D), jnp.float32),
        grid=(N, n_q),
        in_specs=[x_spec] + w_specs,
        out_specs=out_spec,
        compiler_params=pltpu.CompilerParams(
            dimension_semantics=("parallel", "parallel"),
            vmem_limit_bytes=vmem_limit),
    )(x, *param_vals)

    return jnp.transpose(out, (1, 0, 2))                # back to (L, N, D)


# ---------------- pure-JAX reference (for correctness check) ----------------
def reference_block(x_lnd, params, n_head):
    L, N, D = x_lnd.shape
    hd = D // n_head
    scale = 1.0 / np.sqrt(hd)

    def ln(x, g, b):
        mu = jnp.mean(x, axis=-1, keepdims=True)
        var = jnp.mean(jnp.square(x - mu), axis=-1, keepdims=True)
        return (x - mu) / jnp.sqrt(var + 1e-5) * g + b

    out = []
    for n in range(N):
        x = x_lnd[:, n, :]                                            # (L, D)
        xn = ln(x, params["ln1_g"][0], params["ln1_b"][0])
        qkv = xn @ params["wqkv"].T + params["bqkv"][0]
        q, k, v = qkv[:, :D] * scale, qkv[:, D:2 * D], qkv[:, 2 * D:]
        heads = []
        for h in range(n_head):
            qh, kh, vh = (a[:, h * hd:(h + 1) * hd] for a in (q, k, v))
            p = jax.nn.softmax(qh @ kh.T, axis=-1)
            heads.append(p @ vh)
        ctx = jnp.concatenate(heads, axis=-1)
        x = x + ctx @ params["wo"].T + params["bo"][0]
        xn2 = ln(x, params["ln2_g"][0], params["ln2_b"][0])
        hmid = xn2 @ params["wfc"].T + params["bfc"][0]
        hmid = hmid * jax.nn.sigmoid(1.702 * hmid)
        x = x + hmid @ params["wproj"].T + params["bproj"][0]
        out.append(x)
    return jnp.stack(out, axis=1)                                     # (L, N, D)


def make_params(key, d_model):
    ks = jax.random.split(key, 12)
    s = 0.05
    rnd = lambda k, shape: (s * jax.random.normal(k, shape)).astype(jnp.float32)
    return {
        "ln1_g": (1.0 + rnd(ks[0], (1, d_model))),
        "ln1_b": rnd(ks[1], (1, d_model)),
        "wqkv": rnd(ks[2], (3 * d_model, d_model)),
        "bqkv": rnd(ks[3], (1, 3 * d_model)),
        "wo":   rnd(ks[4], (d_model, d_model)),
        "bo":   rnd(ks[5], (1, d_model)),
        "ln2_g": (1.0 + rnd(ks[6], (1, d_model))),
        "ln2_b": rnd(ks[7], (1, d_model)),
        "wfc":  rnd(ks[8], (4 * d_model, d_model)),
        "bfc":  rnd(ks[9], (1, 4 * d_model)),
        "wproj": rnd(ks[10], (d_model, 4 * d_model)),
        "bproj": rnd(ks[11], (1, d_model)),
    }


if __name__ == "__main__":
    # seq=16, batch=2, d_model=128 (lane-dense), n_head=2 -> head_dim=64 (real CLIP head dim)
    L, N, D, H = 16, 2, 128, 2

    key = jax.random.PRNGKey(0)
    kx, kp = jax.random.split(key)
    x = jax.random.normal(kx, (L, N, D), dtype=jnp.float32)           # (L, N, D) like PyTorch
    params = make_params(kp, D)

    # one-time weight prep (model-init time), NOT per forward call
    prepped = prepare_params(params, n_head=H)

    # "others" in the PyTorch forward tuple is a pass-through; only x is computed.
    out = residual_attention_block(x, prepped, n_head=H)
    out = jax.block_until_ready(out)

    ref = reference_block(x, params, n_head=H)
    np.testing.assert_allclose(np.asarray(out), np.asarray(ref), rtol=2e-2, atol=2e-2)

    print("KERNEL_OK")
</pallas_src>

<mosaic_0001>
module attributes {stable_mosaic.version = 11 : i64} {
  func.func @residual_attention_block_kernel(%arg0: i32, %arg1: i32, %arg2: memref<1x16x128xf32, #tpu.memory_space<vmem>>, %arg3: memref<1x128xf32, #tpu.memory_space<vmem>>, %arg4: memref<1x128xf32, #tpu.memory_space<vmem>>, %arg5: memref<128x384xbf16, #tpu.memory_space<vmem>>, %arg6: memref<1x384xf32, #tpu.memory_space<vmem>>, %arg7: memref<128x128xbf16, #tpu.memory_space<vmem>>, %arg8: memref<1x128xf32, #tpu.memory_space<vmem>>, %arg9: memref<1x128xf32, #tpu.memory_space<vmem>>, %arg10: memref<1x128xf32, #tpu.memory_space<vmem>>, %arg11: memref<128x512xbf16, #tpu.memory_space<vmem>>, %arg12: memref<1x512xf32, #tpu.memory_space<vmem>>, %arg13: memref<512x128xbf16, #tpu.memory_space<vmem>>, %arg14: memref<1x128xf32, #tpu.memory_space<vmem>>, %arg15: memref<1x16x128xf32, #tpu.memory_space<vmem>>) attributes {dimension_semantics = [#tpu.dimension_semantics<parallel>, #tpu.dimension_semantics<parallel>], iteration_bounds = array<i64: 2, 1>, scalar_prefetch = 0 : i64, scratch_operands = 0 : i64, tpu.core_type = #tpu.core_type<tc>, window_params = [{transform_indices = @transform_0, window_bounds = array<i64: 1, 16, 128>}, {pipeline_mode = #tpu.pipeline_mode<synchronous>, transform_indices = @transform_1, window_bounds = array<i64: 1, 128>}, {pipeline_mode = #tpu.pipeline_mode<synchronous>, transform_indices = @transform_2, window_bounds = array<i64: 1, 128>}, {pipeline_mode = #tpu.pipeline_mode<synchronous>, transform_indices = @transform_3, window_bounds = array<i64: 128, 384>}, {pipeline_mode = #tpu.pipeline_mode<synchronous>, transform_indices = @transform_4, window_bounds = array<i64: 1, 384>}, {pipeline_mode = #tpu.pipeline_mode<synchronous>, transform_indices = @transform_5, window_bounds = array<i64: 128, 128>}, {pipeline_mode = #tpu.pipeline_mode<synchronous>, transform_indices = @transform_6, window_bounds = array<i64: 1, 128>}, {pipeline_mode = #tpu.pipeline_mode<synchronous>, transform_indices = @transform_7, window_bounds = array<i64: 1, 128>}, {pipeline_mode = #tpu.pipeline_mode<synchronous>, transform_indices = @transform_8, window_bounds = array<i64: 1, 128>}, {pipeline_mode = #tpu.pipeline_mode<synchronous>, transform_indices = @transform_9, window_bounds = array<i64: 128, 512>}, {pipeline_mode = #tpu.pipeline_mode<synchronous>, transform_indices = @transform_10, window_bounds = array<i64: 1, 512>}, {pipeline_mode = #tpu.pipeline_mode<synchronous>, transform_indices = @transform_11, window_bounds = array<i64: 512, 128>}, {pipeline_mode = #tpu.pipeline_mode<synchronous>, transform_indices = @transform_12, window_bounds = array<i64: 1, 128>}, {transform_indices = @transform_13, window_bounds = array<i64: 1, 16, 128>}]} {
    %c16_i32 = arith.constant 16 : i32
    %0 = arith.muli %arg1, %c16_i32 : i32
    %1 = tpu.assume_multiple %0, 16 : i32
    %c0 = arith.constant 0 : index
    %2 = arith.index_cast %1 : i32 to index
    %c0_0 = arith.constant 0 : index
    %3 = vector.load %arg2[%c0, %2, %c0_0] : memref<1x16x128xf32, #tpu.memory_space<vmem>>, vector<1x16x128xf32>
    %4 = vector.shape_cast %3 : vector<1x16x128xf32> to vector<16x128xf32>
    %c0_1 = arith.constant 0 : index
    %c0_2 = arith.constant 0 : index
    %c0_3 = arith.constant 0 : index
    %5 = vector.load %arg2[%c0_1, %c0_2, %c0_3] : memref<1x16x128xf32, #tpu.memory_space<vmem>>, vector<1x16x128xf32>
    %6 = vector.shape_cast %5 : vector<1x16x128xf32> to vector<16x128xf32>
    %c0_4 = arith.constant 0 : index
    %c0_5 = arith.constant 0 : index
    %7 = vector.load %arg3[%c0_4, %c0_5] : memref<1x128xf32, #tpu.memory_space<vmem>>, vector<1x128xf32>
    %8 = vector.shape_cast %7 : vector<1x128xf32> to vector<128xf32>
    %c0_6 = arith.constant 0 : index
    %c0_7 = arith.constant 0 : index
    %9 = vector.load %arg4[%c0_6, %c0_7] : memref<1x128xf32, #tpu.memory_space<vmem>>, vector<1x128xf32>
    %10 = vector.shape_cast %9 : vector<1x128xf32> to vector<128xf32>
    %cst = arith.constant dense<0.000000e+00> : vector<16xf32>
    %11 = vector.multi_reduction <add>, %6, %cst [1] : vector<16x128xf32> to vector<16xf32>
    %12 = vector.shape_cast %11 : vector<16xf32> to vector<16x1xf32>
    %cst_8 = arith.constant 1.280000e+02 : f32
    %13 = vector.broadcast %cst_8 : f32 to vector<16x1xf32>
    %14 = arith.divf %12, %13 : vector<16x1xf32>
    %15 = vector.broadcast %14 : vector<16x1xf32> to vector<16x128xf32>
    %16 = arith.subf %6, %15 : vector<16x128xf32>
    %17 = arith.mulf %16, %16 : vector<16x128xf32>
    %cst_9 = arith.constant dense<0.000000e+00> : vector<16xf32>
    %18 = vector.multi_reduction <add>, %17, %cst_9 [1] : vector<16x128xf32> to vector<16xf32>
    %19 = vector.shape_cast %18 : vector<16xf32> to vector<16x1xf32>
    %cst_10 = arith.constant 1.280000e+02 : f32
    %20 = vector.broadcast %cst_10 : f32 to vector<16x1xf32>
    %21 = arith.divf %19, %20 : vector<16x1xf32>
    %22 = vector.broadcast %14 : vector<16x1xf32> to vector<16x128xf32>
    %23 = arith.subf %6, %22 : vector<16x128xf32>
    %cst_11 = arith.constant 9.99999974E-6 : f32
    %24 = vector.broadcast %cst_11 : f32 to vector<16x1xf32>
    %25 = arith.addf %21, %24 : vector<16x1xf32>
    %26 = math.rsqrt %25 : vector<16x1xf32>
    %27 = vector.broadcast %26 : vector<16x1xf32> to vector<16x128xf32>
    %28 = arith.mulf %23, %27 : vector<16x128xf32>
    %29 = vector.shape_cast %8 : vector<128xf32> to vector<1x128xf32>
    %30 = vector.broadcast %29 : vector<1x128xf32> to vector<16x128xf32>
    %31 = arith.mulf %28, %30 : vector<16x128xf32>
    %32 = vector.shape_cast %10 : vector<128xf32> to vector<1x128xf32>
    %33 = vector.broadcast %32 : vector<1x128xf32> to vector<16x128xf32>
    %34 = arith.addf %31, %33 : vector<16x128xf32>
    %35 = arith.truncf %34 : vector<16x128xf32> to vector<16x128xbf16>
    %c0_12 = arith.constant 0 : index
    %c0_13 = arith.constant 0 : index
    %36 = vector.load %arg3[%c0_12, %c0_13] : memref<1x128xf32, #tpu.memory_space<vmem>>, vector<1x128xf32>
    %37 = vector.shape_cast %36 : vector<1x128xf32> to vector<128xf32>
    %c0_14 = arith.constant 0 : index
    %c0_15 = arith.constant 0 : index
    %38 = vector.load %arg4[%c0_14, %c0_15] : memref<1x128xf32, #tpu.memory_space<vmem>>, vector<1x128xf32>
    %39 = vector.shape_cast %38 : vector<1x128xf32> to vector<128xf32>
    %cst_16 = arith.constant dense<0.000000e+00> : vector<16xf32>
    %40 = vector.multi_reduction <add>, %4, %cst_16 [1] : vector<16x128xf32> to vector<16xf32>
    %41 = vector.shape_cast %40 : vector<16xf32> to vector<16x1xf32>
    %cst_17 = arith.constant 1.280000e+02 : f32
    %42 = vector.broadcast %cst_17 : f32 to vector<16x1xf32>
    %43 = arith.divf %41, %42 : vector<16x1xf32>
    %44 = vector.broadcast %43 : vector<16x1xf32> to vector<16x128xf32>
    %45 = arith.subf %4, %44 : vector<16x128xf32>
    %46 = arith.mulf %45, %45 : vector<16x128xf32>
    %cst_18 = arith.constant dense<0.000000e+00> : vector<16xf32>
    %47 = vector.multi_reduction <add>, %46, %cst_18 [1] : vector<16x128xf32> to vector<16xf32>
    %48 = vector.shape_cast %47 : vector<16xf32> to vector<16x1xf32>
    %cst_19 = arith.constant 1.280000e+02 : f32
    %49 = vector.broadcast %cst_19 : f32 to vector<16x1xf32>
    %50 = arith.divf %48, %49 : vector<16x1xf32>
    %51 = vector.broadcast %43 : vector<16x1xf32> to vector<16x128xf32>
    %52 = arith.subf %4, %51 : vector<16x128xf32>
    %cst_20 = arith.constant 9.99999974E-6 : f32
    %53 = vector.broadcast %cst_20 : f32 to vector<16x1xf32>
    %54 = arith.addf %50, %53 : vector<16x1xf32>
    %55 = math.rsqrt %54 : vector<16x1xf32>
    %56 = vector.broadcast %55 : vector<16x1xf32> to vector<16x128xf32>
    %57 = arith.mulf %52, %56 : vector<16x128xf32>
    %58 = vector.shape_cast %37 : vector<128xf32> to vector<1x128xf32>
    %59 = vector.broadcast %58 : vector<1x128xf32> to vector<16x128xf32>
    %60 = arith.mulf %57, %59 : vector<16x128xf32>
    %61 = vector.shape_cast %39 : vector<128xf32> to vector<1x128xf32>
    %62 = vector.broadcast %61 : vector<1x128xf32> to vector<16x128xf32>
    %63 = arith.addf %60, %62 : vector<16x128xf32>
    %64 = arith.truncf %63 : vector<16x128xf32> to vector<16x128xbf16>
    %c0_21 = arith.constant 0 : index
    %c0_22 = arith.constant 0 : index
    %65 = vector.load %arg5[%c0_21, %c0_22] : memref<128x384xbf16, #tpu.memory_space<vmem>>, vector<128x384xbf16>
    %c0_23 = arith.constant 0 : index
    %c0_24 = arith.constant 0 : index
    %66 = vector.load %arg6[%c0_23, %c0_24] : memref<1x384xf32, #tpu.memory_space<vmem>>, vector<1x384xf32>
    %67 = vector.shape_cast %66 : vector<1x384xf32> to vector<384xf32>
    %68 = vector.extract_strided_slice %65 {offsets = [0, 128], sizes = [128, 256], strides = [1, 1]} : vector<128x384xbf16> to vector<128x256xbf16>
    %cst_25 = arith.constant dense<0.000000e+00> : vector<16x256xf32>
    %69 = tpu.matmul %35, %68, %cst_25 {dimension_numbers = #tpu.dot_dimension_numbers<[1], [0], [0], [1], [0, 0, 1, 1], [], []>} : vector<16x128xbf16>, vector<128x256xbf16>, vector<16x256xf32> -> vector<16x256xf32>
    %70 = vector.extract_strided_slice %67 {offsets = [128], sizes = [256], strides = [1]} : vector<384xf32> to vector<256xf32>
    %71 = vector.shape_cast %70 : vector<256xf32> to vector<1x256xf32>
    %72 = vector.broadcast %71 : vector<1x256xf32> to vector<16x256xf32>
    %73 = arith.addf %69, %72 : vector<16x256xf32>
    %74 = vector.extract_strided_slice %65 {offsets = [0, 0], sizes = [128, 128], strides = [1, 1]} : vector<128x384xbf16> to vector<128x128xbf16>
    %cst_26 = arith.constant dense<0.000000e+00> : vector<16x128xf32>
    %75 = tpu.matmul %64, %74, %cst_26 {dimension_numbers = #tpu.dot_dimension_numbers<[1], [0], [0], [1], [0, 0, 1, 1], [], []>} : vector<16x128xbf16>, vector<128x128xbf16>, vector<16x128xf32> -> vector<16x128xf32>
    %76 = vector.extract_strided_slice %67 {offsets = [0], sizes = [128], strides = [1]} : vector<384xf32> to vector<128xf32>
    %77 = vector.shape_cast %76 : vector<128xf32> to vector<1x128xf32>
    %78 = vector.broadcast %77 : vector<1x128xf32> to vector<16x128xf32>
    %79 = arith.addf %75, %78 : vector<16x128xf32>
    %80 = vector.shape_cast %79 : vector<16x128xf32> to vector<16x2x64xf32>
    %81 = arith.truncf %80 : vector<16x2x64xf32> to vector<16x2x64xbf16>
    %82 = tpu.transpose %81, [1, 0, 2] : vector<16x2x64xbf16> -> vector<2x16x64xbf16>
    %83 = vector.extract_strided_slice %73 {offsets = [0, 0], sizes = [16, 128], strides = [1, 1]} : vector<16x256xf32> to vector<16x128xf32>
    %84 = vector.shape_cast %83 : vector<16x128xf32> to vector<16x2x64xf32>
    %85 = arith.truncf %84 : vector<16x2x64xf32> to vector<16x2x64xbf16>
    %86 = tpu.transpose %85, [1, 0, 2] : vector<16x2x64xbf16> -> vector<2x16x64xbf16>
    %87 = vector.extract_strided_slice %73 {offsets = [0, 128], sizes = [16, 128], strides = [1, 1]} : vector<16x256xf32> to vector<16x128xf32>
    %88 = vector.shape_cast %87 : vector<16x128xf32> to vector<16x2x64xf32>
    %89 = arith.truncf %88 : vector<16x2x64xf32> to vector<16x2x64xbf16>
    %90 = tpu.transpose %89, [1, 0, 2] : vector<16x2x64xbf16> -> vector<2x16x64xbf16>
    "tpu.trace_start"() <{level = 10 : i32, message = "hqe,hke->hqk"}> : () -> ()
    %cst_27 = arith.constant dense<0.000000e+00> : vector<2x16x16xf32>
    %91 = tpu.matmul %82, %86, %cst_27 {dimension_numbers = #tpu.dot_dimension_numbers<[2], [2], [1], [1], [0, 0, 0, 1, 1, 1], [0], [0]>} : vector<2x16x64xbf16>, vector<2x16x64xbf16>, vector<2x16x16xf32> -> vector<2x16x16xf32>
    "tpu.trace_stop"() : () -> ()
    %cst_28 = arith.constant dense<0xFF800000> : vector<2x16xf32>
    %92 = vector.multi_reduction <maximumf>, %91, %cst_28 [2] : vector<2x16x16xf32> to vector<2x16xf32>
    %93 = vector.shape_cast %92 : vector<2x16xf32> to vector<2x16x1xf32>
    %94 = vector.broadcast %93 : vector<2x16x1xf32> to vector<2x16x16xf32>
    %95 = arith.subf %91, %94 : vector<2x16x16xf32>
    %96 = math.exp %95 : vector<2x16x16xf32>
    %cst_29 = arith.constant dense<0.000000e+00> : vector<2x16xf32>
    %97 = vector.multi_reduction <add>, %96, %cst_29 [2] : vector<2x16x16xf32> to vector<2x16xf32>
    %98 = vector.shape_cast %97 : vector<2x16xf32> to vector<2x16x1xf32>
    %99 = tpu.reciprocal %98 {approx = true} : vector<2x16x1xf32> -> vector<2x16x1xf32>
    %100 = vector.broadcast %99 : vector<2x16x1xf32> to vector<2x16x16xf32>
    %101 = arith.mulf %96, %100 : vector<2x16x16xf32>
    %102 = arith.truncf %101 : vector<2x16x16xf32> to vector<2x16x16xbf16>
    "tpu.trace_start"() <{level = 10 : i32, message = "hqk,hke->hqe"}> : () -> ()
    %cst_30 = arith.constant dense<0.000000e+00> : vector<2x16x64xf32>
    %103 = tpu.matmul %102, %90, %cst_30 {dimension_numbers = #tpu.dot_dimension_numbers<[2], [1], [1], [2], [0, 0, 0, 1, 1, 2], [0], [0]>} : vector<2x16x16xbf16>, vector<2x16x64xbf16>, vector<2x16x64xf32> -> vector<2x16x64xf32>
    "tpu.trace_stop"() : () -> ()
    %104 = arith.truncf %103 : vector<2x16x64xf32> to vector<2x16x64xbf16>
    %105 = tpu.transpose %104, [1, 0, 2] : vector<2x16x64xbf16> -> vector<16x2x64xbf16>
    %106 = vector.shape_cast %105 : vector<16x2x64xbf16> to vector<16x128xbf16>
    %c0_31 = arith.constant 0 : index
    %c0_32 = arith.constant 0 : index
    %107 = vector.load %arg7[%c0_31, %c0_32] : memref<128x128xbf16, #tpu.memory_space<vmem>>, vector<128x128xbf16>
    %cst_33 = arith.constant dense<0.000000e+00> : vector<16x128xf32>
    %108 = tpu.matmul %106, %107, %cst_33 {dimension_numbers = #tpu.dot_dimension_numbers<[1], [0], [0], [1], [0, 0, 1, 1], [], []>} : vector<16x128xbf16>, vector<128x128xbf16>, vector<16x128xf32> -> vector<16x128xf32>
    %c0_34 = arith.constant 0 : index
    %c0_35 = arith.constant 0 : index
    %109 = vector.load %arg8[%c0_34, %c0_35] : memref<1x128xf32, #tpu.memory_space<vmem>>, vector<1x128xf32>
    %110 = vector.shape_cast %109 : vector<1x128xf32> to vector<128xf32>
    %111 = vector.shape_cast %110 : vector<128xf32> to vector<1x128xf32>
    %112 = vector.broadcast %111 : vector<1x128xf32> to vector<16x128xf32>
    %113 = arith.addf %108, %112 : vector<16x128xf32>
    %114 = arith.addf %4, %113 : vector<16x128xf32>
    %c0_36 = arith.constant 0 : index
    %c0_37 = arith.constant 0 : index
    %115 = vector.load %arg9[%c0_36, %c0_37] : memref<1x128xf32, #tpu.memory_space<vmem>>, vector<1x128xf32>
    %116 = vector.shape_cast %115 : vector<1x128xf32> to vector<128xf32>
    %c0_38 = arith.constant 0 : index
    %c0_39 = arith.constant 0 : index
    %117 = vector.load %arg10[%c0_38, %c0_39] : memref<1x128xf32, #tpu.memory_space<vmem>>, vector<1x128xf32>
    %118 = vector.shape_cast %117 : vector<1x128xf32> to vector<128xf32>
    %cst_40 = arith.constant dense<0.000000e+00> : vector<16xf32>
    %119 = vector.multi_reduction <add>, %114, %cst_40 [1] : vector<16x128xf32> to vector<16xf32>
    %120 = vector.shape_cast %119 : vector<16xf32> to vector<16x1xf32>
    %cst_41 = arith.constant 1.280000e+02 : f32
    %121 = vector.broadcast %cst_41 : f32 to vector<16x1xf32>
    %122 = arith.divf %120, %121 : vector<16x1xf32>
    %123 = vector.broadcast %122 : vector<16x1xf32> to vector<16x128xf32>
    %124 = arith.subf %114, %123 : vector<16x128xf32>
    %125 = arith.mulf %124, %124 : vector<16x128xf32>
    %cst_42 = arith.constant dense<0.000000e+00> : vector<16xf32>
    %126 = vector.multi_reduction <add>, %125, %cst_42 [1] : vector<16x128xf32> to vector<16xf32>
    %127 = vector.shape_cast %126 : vector<16xf32> to vector<16x1xf32>
    %cst_43 = arith.constant 1.280000e+02 : f32
    %128 = vector.broadcast %cst_43 : f32 to vector<16x1xf32>
    %129 = arith.divf %127, %128 : vector<16x1xf32>
    %130 = vector.broadcast %122 : vector<16x1xf32> to vector<16x128xf32>
    %131 = arith.subf %114, %130 : vector<16x128xf32>
    %cst_44 = arith.constant 9.99999974E-6 : f32
    %132 = vector.broadcast %cst_44 : f32 to vector<16x1xf32>
    %133 = arith.addf %129, %132 : vector<16x1xf32>
    %134 = math.rsqrt %133 : vector<16x1xf32>
    %135 = vector.broadcast %134 : vector<16x1xf32> to vector<16x128xf32>
    %136 = arith.mulf %131, %135 : vector<16x128xf32>
    %137 = vector.shape_cast %116 : vector<128xf32> to vector<1x128xf32>
    %138 = vector.broadcast %137 : vector<1x128xf32> to vector<16x128xf32>
    %139 = arith.mulf %136, %138 : vector<16x128xf32>
    %140 = vector.shape_cast %118 : vector<128xf32> to vector<1x128xf32>
    %141 = vector.broadcast %140 : vector<1x128xf32> to vector<16x128xf32>
    %142 = arith.addf %139, %141 : vector<16x128xf32>
    %143 = arith.truncf %142 : vector<16x128xf32> to vector<16x128xbf16>
    %c0_45 = arith.constant 0 : index
    %c0_46 = arith.constant 0 : index
    %144 = vector.load %arg11[%c0_45, %c0_46] : memref<128x512xbf16, #tpu.memory_space<vmem>>, vector<128x512xbf16>
    %cst_47 = arith.constant dense<0.000000e+00> : vector<16x512xf32>
    %145 = tpu.matmul %143, %144, %cst_47 {dimension_numbers = #tpu.dot_dimension_numbers<[1], [0], [0], [1], [0, 0, 1, 1], [], []>} : vector<16x128xbf16>, vector<128x512xbf16>, vector<16x512xf32> -> vector<16x512xf32>
    %c0_48 = arith.constant 0 : index
    %c0_49 = arith.constant 0 : index
    %146 = vector.load %arg12[%c0_48, %c0_49] : memref<1x512xf32, #tpu.memory_space<vmem>>, vector<1x512xf32>
    %147 = vector.shape_cast %146 : vector<1x512xf32> to vector<512xf32>
    %148 = vector.shape_cast %147 : vector<512xf32> to vector<1x512xf32>
    %149 = vector.broadcast %148 : vector<1x512xf32> to vector<16x512xf32>
    %150 = arith.addf %145, %149 : vector<16x512xf32>
    %cst_50 = arith.constant 1.702000e+00 : f32
    %151 = vector.broadcast %cst_50 : f32 to vector<16x512xf32>
    %152 = arith.mulf %151, %150 : vector<16x512xf32>
    %153 = arith.negf %152 : vector<16x512xf32>
    %154 = math.exp %153 : vector<16x512xf32>
    %cst_51 = arith.constant 1.000000e+00 : f32
    %155 = vector.broadcast %cst_51 : f32 to vector<16x512xf32>
    %156 = arith.addf %155, %154 : vector<16x512xf32>
    %157 = arith.divf %155, %156 : vector<16x512xf32>
    %158 = arith.mulf %150, %157 : vector<16x512xf32>
    %159 = arith.truncf %158 : vector<16x512xf32> to vector<16x512xbf16>
    %c0_52 = arith.constant 0 : index
    %c0_53 = arith.constant 0 : index
    %160 = vector.load %arg13[%c0_52, %c0_53] : memref<512x128xbf16, #tpu.memory_space<vmem>>, vector<512x128xbf16>
    %cst_54 = arith.constant dense<0.000000e+00> : vector<16x128xf32>
    %161 = tpu.matmul %159, %160, %cst_54 {dimension_numbers = #tpu.dot_dimension_numbers<[1], [0], [0], [1], [0, 0, 1, 1], [], []>} : vector<16x512xbf16>, vector<512x128xbf16>, vector<16x128xf32> -> vector<16x128xf32>
    %c0_55 = arith.constant 0 : index
    %c0_56 = arith.constant 0 : index
    %162 = vector.load %arg14[%c0_55, %c0_56] : memref<1x128xf32, #tpu.memory_space<vmem>>, vector<1x128xf32>
    %163 = vector.shape_cast %162 : vector<1x128xf32> to vector<128xf32>
    %164 = vector.shape_cast %163 : vector<128xf32> to vector<1x128xf32>
    %165 = vector.broadcast %164 : vector<1x128xf32> to vector<16x128xf32>
    %166 = arith.addf %161, %165 : vector<16x128xf32>
    %167 = arith.addf %114, %166 : vector<16x128xf32>
    %c0_57 = arith.constant 0 : index
    %c0_58 = arith.constant 0 : index
    %c0_59 = arith.constant 0 : index
    %168 = vector.load %arg15[%c0_57, %c0_58, %c0_59] : memref<1x16x128xf32, #tpu.memory_space<vmem>>, vector<1x16x128xf32>
    %169 = vector.shape_cast %168 : vector<1x16x128xf32> to vector<16x128xf32>
    %170 = vector.shape_cast %167 : vector<16x128xf32> to vector<1x16x128xf32>
    tpu.vector_store %arg15[%c0_57, %c0_58, %c0_59], %170 {strides = array<i32>} : memref<1x16x128xf32, #tpu.memory_space<vmem>>, vector<1x16x128xf32>,
    return
  }
  func.func @transform_0(%arg0: i32, %arg1: i32) -> (i32, i32, i32) {
    %c0_i32 = arith.constant 0 : i32
    %c0_i32_0 = arith.constant 0 : i32
    %c0_i32_1 = arith.constant 0 : i32
    return %arg0, %c0_i32, %c0_i32_0 : i32, i32, i32
  }
  func.func @transform_1(%arg0: i32, %arg1: i32) -> (i32, i32) {
    %c0_i32 = arith.constant 0 : i32
    %c0_i32_0 = arith.constant 0 : i32
    %c0_i32_1 = arith.constant 0 : i32
    return %c0_i32, %c0_i32_0 : i32, i32
  }
  func.func @transform_2(%arg0: i32, %arg1: i32) -> (i32, i32) {
    %c0_i32 = arith.constant 0 : i32
    %c0_i32_0 = arith.constant 0 : i32
    %c0_i32_1 = arith.constant 0 : i32
    return %c0_i32, %c0_i32_0 : i32, i32
  }
  func.func @transform_3(%arg0: i32, %arg1: i32) -> (i32, i32) {
    %c0_i32 = arith.constant 0 : i32
    %c0_i32_0 = arith.constant 0 : i32
    %c0_i32_1 = arith.constant 0 : i32
    return %c0_i32, %c0_i32_0 : i32, i32
  }
  func.func @transform_4(%arg0: i32, %arg1: i32) -> (i32, i32) {
    %c0_i32 = arith.constant 0 : i32
    %c0_i32_0 = arith.constant 0 : i32
    %c0_i32_1 = arith.constant 0 : i32
    return %c0_i32, %c0_i32_0 : i32, i32
  }
  func.func @transform_5(%arg0: i32, %arg1: i32) -> (i32, i32) {
    %c0_i32 = arith.constant 0 : i32
    %c0_i32_0 = arith.constant 0 : i32
    %c0_i32_1 = arith.constant 0 : i32
    return %c0_i32, %c0_i32_0 : i32, i32
  }
  func.func @transform_6(%arg0: i32, %arg1: i32) -> (i32, i32) {
    %c0_i32 = arith.constant 0 : i32
    %c0_i32_0 = arith.constant 0 : i32
    %c0_i32_1 = arith.constant 0 : i32
    return %c0_i32, %c0_i32_0 : i32, i32
  }
  func.func @transform_7(%arg0: i32, %arg1: i32) -> (i32, i32) {
    %c0_i32 = arith.constant 0 : i32
    %c0_i32_0 = arith.constant 0 : i32
    %c0_i32_1 = arith.constant 0 : i32
    return %c0_i32, %c0_i32_0 : i32, i32
  }
  func.func @transform_8(%arg0: i32, %arg1: i32) -> (i32, i32) {
    %c0_i32 = arith.constant 0 : i32
    %c0_i32_0 = arith.constant 0 : i32
    %c0_i32_1 = arith.constant 0 : i32
    return %c0_i32, %c0_i32_0 : i32, i32
  }
  func.func @transform_9(%arg0: i32, %arg1: i32) -> (i32, i32) {
    %c0_i32 = arith.constant 0 : i32
    %c0_i32_0 = arith.constant 0 : i32
    %c0_i32_1 = arith.constant 0 : i32
    return %c0_i32, %c0_i32_0 : i32, i32
  }
  func.func @transform_10(%arg0: i32, %arg1: i32) -> (i32, i32) {
    %c0_i32 = arith.constant 0 : i32
    %c0_i32_0 = arith.constant 0 : i32
    %c0_i32_1 = arith.constant 0 : i32
    return %c0_i32, %c0_i32_0 : i32, i32
  }
  func.func @transform_11(%arg0: i32, %arg1: i32) -> (i32, i32) {
    %c0_i32 = arith.constant 0 : i32
    %c0_i32_0 = arith.constant 0 : i32
    %c0_i32_1 = arith.constant 0 : i32
    return %c0_i32, %c0_i32_0 : i32, i32
  }
  func.func @transform_12(%arg0: i32, %arg1: i32) -> (i32, i32) {
    %c0_i32 = arith.constant 0 : i32
    %c0_i32_0 = arith.constant 0 : i32
    %c0_i32_1 = arith.constant 0 : i32
    return %c0_i32, %c0_i32_0 : i32, i32
  }
  func.func @transform_13(%arg0: i32, %arg1: i32) -> (i32, i32, i32) {
    %c0_i32 = arith.constant 0 : i32
    %c0_i32_0 = arith.constant 0 : i32
    return %arg0, %arg1, %c0_i32 : i32, i32, i32
  }
}

</mosaic_0001>

<bundles_post_ra>
// kernel: tpu_custom_call.1
= control target key start
LH: loop header
LB: loop body
LE: loop exit
PB: predicated region body
PF: predicated region fallthrough
CT: control target
= control target key end

     0   :  { %s4864_s0 = inlined_call_operand.hbm [shape: f32[2,16,128], index: 0, kind: input, shape index: {}]   ;;  %s4865_s1 = inlined_call_operand.hbm [shape: f32[1,128], index: 1, kind: input, shape index: {}]   ;;  %s4866_s2 = inlined_call_operand.hbm [shape: f32[1,128], index: 2, kind: input, shape index: {}]   ;;  %s4867_s3 = inlined_call_operand.hbm [shape: bf16[128,384], index: 3, kind: input, shape index: {}]   ;;  %s4868_s4 = inlined_call_operand.vmem [shape: f32[1,384], index: 4, kind: input, shape index: {}]   ;;  %s4869_s5 = inlined_call_operand.hbm [shape: bf16[128,128], index: 5, kind: input, shape index: {}]   ;;  %s4870_s6 = inlined_call_operand.vmem [shape: f32[1,128], index: 6, kind: input, shape index: {}]   ;;  %s4871_s7 = inlined_call_operand.vmem [shape: f32[1,128], index: 7, kind: input, shape index: {}]   ;;  %s4872_s8 = inlined_call_operand.vmem [shape: f32[1,128], index: 8, kind: input, shape index: {}]   ;;  %s4873_s9 = inlined_call_operand.hbm [shape: bf16[128,512], index: 9, kind: input, shape index: {}]   ;;  %s4874_s10 = inlined_call_operand.vmem [shape: f32[1,512], index: 10, kind: input, shape index: {}]   ;;  %s4875_s11 = inlined_call_operand.hbm [shape: bf16[512,128], index: 11, kind: input, shape index: {}]   ;;  %s4876_s12 = inlined_call_operand.vmem [shape: f32[1,128], index: 12, kind: input, shape index: {}]   ;;  %s4877_s13 = inlined_call_operand.hbm [shape: f32[2,16,128], index: 13, kind: output, shape index: {}]  }
   0x1   :  { %4884 = sst [smem:[#allocation21_spill]] %s4865_s1 }
   0x2   :  { %4885 = sst [smem:[#allocation22_spill]] %s4867_s3 }
   0x3   :  { %4886 = sst [smem:[#allocation23_spill]] %s4870_s6 }
   0x4   :  { %4887 = sst [smem:[#allocation24_spill]] %s4871_s7 }
   0x5   :  { %4888 = sst [smem:[#allocation25_spill]] %s4872_s8 }
   0x6   :  { %4889 = sst [smem:[#allocation26_spill]] %s4874_s10 }
   0x7   :  { %4890 = sst [smem:[#allocation27_spill]] %s4876_s12 }
   0x8   :  { %4891 = sst [smem:[#allocation28_spill]] %s4877_s13 }
   0x9   :  { %18 = vsyncpa [#allocation3], 0 }
   0xa   :  { %20 = vsyncpa [#allocation3 + $0x1], 0 }
   0xb   :  { %21 = vsyncpa [#allocation6], 0 }
   0xc   :  { %22 = vsyncpa [#allocation9], 0 }
   0xd   :  { %23 = vsyncpa [#allocation12], 0 }
   0xe   :  { %24 = vsyncpa [#allocation4], 0 }
   0xf   :  { %26 = vsyncpa [#allocation4 + $0x1], 0  ;;  %s4176_s25 = smov 0   ;;  %s4178_s26 = smov 0  }
  0x10   :  { %s4180_s27 = smov 0   ;;  %s4182_s28 = smov 0  }
  0x11   :  { %s4184_s29 = smov 0   ;;  %s4186_s30 = smov 0  }
  0x12 LB: > { %4892 = sst [smem:[#allocation20_spill]] %s4072_s28  ;;  %s4878_s14 = sadd.s32 4294967295, %s4080_s30   ;;  %s4080_s30 = sphi %s4186_s30, %s32_s30   ;;  %s4076_s29 = sphi %s4184_s29, %s4923_s29   ;;  %s4072_s28 = sphi %s4182_s28, %s4922_s28   ;;  %s4068_s27 = sphi %s4180_s27, %s4921_s27   ;;  %s4064_s26 = sphi %s4178_s26, %s4920_s26   ;;  %s4060_s25 = sphi %s4176_s25, %s4919_s25  }
  0x13   : > { %p3164_p0 = scmp.ge.s32.totalorder %s4080_s30, 1  ;;  %p4210_p1 = scmp.eq.s32.totalorder %s4878_s14, 0 }
  0x14   : > { %p355_p2 = scmp.lt.s32.totalorder %s4080_s30, 3  ;;  %s4082_s17 = smov [#allocation5]  }
  0x15   : > { %s4893_s15 = scalar_select %p4210_p1, 1, 0 }
  0x16   : > { %p4215_p3 = pnand %p3164_p0, %p355_p2  ;;  %s368_s18 = sshll.u32 %s4082_s17, 4  ;;  %s369_s18 = int_to_ptr.vmem [resolvable:$true] %s368_s18 }
  0x17   : > { %s4083_s19 = smov [#allocation8]   ;;  %s4084_s22 = smov [#allocation11]  }
  0x18   : > { %s4894_s16 = scalar_select %p4215_p3, 1, 0 }
  0x19   : > { %p3495_p5 = pneg %p4215_p3  ;;  %s389_s20 = sshll.u32 %s4083_s19, 4  ;;  %s4228_s20 = int_to_ptr.vmem [resolvable:$true] %s389_s20 }
  0x1a   : > { %s4230_s23 = sshll.u32 %s4084_s22, 4  ;;  %s4896_s1 = sld [smem:[#allocation21_spill]]  ;;  %s428_s23 = int_to_ptr.vmem [resolvable:$true] %s4230_s23 }
  0x1b   : > { %p4224_p6 = pnand %p3495_p5, %p4210_p1 }
  0x1d   : > { %p4240_p8 = pneg %p4224_p6 }
  0x20   : > { %s3788_s17 = scalar_lea.hbm %s4896_s1, 16 }
  0x21   : > { %p3789_p7 = scmp.ne.s32.totalorder %s4896_s1, %s3788_s17  ;;  %p3795_p11 = scmp.lt.u32.totalorder %s3788_s17, %s4896_s1 }
  0x23   : > { %p3791_p9 = pnand %p4240_p8, %p3789_p7 }
  0x25   : > { %p3792_p10 = pneg %p3791_p9 }
  0x27   : > { %p3797_p12 = pnand %p3795_p11, %p3792_p10 }
  0x29   : > { %3800 = shalt.err (!%p3797_p12)
}
  0x2a   : > { %s3801_s14 = scalar_lea.vmem %s369_s18, 16  ;;  %s3808_s13 = scalar_lea.vmem %s369_s18, 32 }
  0x2b   : > { %p3802_p13 = scmp.ne.s32.totalorder %s369_s18, %s3801_s14  ;;  %p3809_p5 = scmp.lt.s32.totalorder %s369_s18, %s369_s18 }
  0x2c   : > { %p3810_p4 = scmp.lt.s32.totalorder %s3808_s13, %s3801_s14 }
  0x2d   : > { %p3804_p0 = pnand %p3802_p13, %p4240_p8 }
  0x2e   : > { %p3811_p3 = por %p3810_p4, %p3809_p5 }
  0x2f   : > { %p3805_p2 = pneg %p3804_p0 }
  0x31   : > { %p3812_p1 = pnand %p3811_p3, %p3805_p2 }
  0x33   : > { %3815 = shalt.err (!%p3812_p1)
}
  0x34   : > { %3498 = dma.hbm_to_vmem [thread:$0]  (!%p4224_p6), %s4896_s1, 16, %s369_s18, [#allocation6]  }
  0x35   : > { %s4898_s3 = sld [smem:[#allocation22_spill]] }
  0x3b   : > { %s3816_s22 = scalar_lea.hbm %s4898_s3, 3072 }
  0x3c   : > { %p3817_p7 = scmp.ne.s32.totalorder %s4898_s3, %s3816_s22  ;;  %p3823_p1 = scmp.lt.u32.totalorder %s3816_s22, %s4898_s3 }
  0x3e   : > { %p3819_p9 = pnand %p3817_p7, %p4240_p8 }
  0x40   : > { %p3820_p4 = pneg %p3819_p9 }
  0x42   : > { %p3825_p3 = pnand %p3823_p1, %p3820_p4 }
  0x44   : > { %3828 = shalt.err (!%p3825_p3)
}
  0x45   : > { %s3829_s18 = scalar_lea.vmem %s4228_s20, 3072  ;;  %p3837_p13 = scmp.lt.s32.totalorder %s4228_s20, %s4228_s20 }
  0x46   : > { %p3830_p10 = scmp.ne.s32.totalorder %s4228_s20, %s3829_s18  ;;  %p3838_p0 = scmp.lt.s32.totalorder %s3829_s18, %s3829_s18 }
  0x48   : > { %p3832_p11 = pnand %p3830_p10, %p4240_p8  ;;  %p3839_p2 = por %p3838_p0, %p3837_p13 }
  0x4a   : > { %p3833_p12 = pneg %p3832_p11 }
  0x4c   : > { %p3840_p5 = pnand %p3839_p2, %p3833_p12 }
  0x4e   : > { %3843 = shalt.err (!%p3840_p5)
}
  0x4f   : > { %s4085_s8 = smov 192   ;;  %s4086_s10 = smov 12  }
  0x50   : > { %3504 = dma.hbm_to_vmem [thread:$0]  (!%p4224_p6), %s4898_s3, 3072, %s4228_s20, [#allocation9], %s4085_s8, %s4085_s8, %s4086_s10  }
  0x51   : > { %s3844_s22 = scalar_lea.hbm %s4873_s9, 4096 }
  0x52   : > { %p3845_p7 = scmp.ne.s32.totalorder %s4873_s9, %s3844_s22  ;;  %p3851_p1 = scmp.lt.u32.totalorder %s3844_s22, %s4873_s9 }
  0x54   : > { %p3847_p9 = pnand %p3845_p7, %p4240_p8 }
  0x56   : > { %p3848_p4 = pneg %p3847_p9 }
  0x58   : > { %p3853_p3 = pnand %p3851_p1, %p3848_p4 }
  0x5a   : > { %3856 = shalt.err (!%p3853_p3)
}
  0x5b   : > { %s3857_s28 = scalar_lea.vmem %s428_s23, 4096  ;;  %p3865_p13 = scmp.lt.s32.totalorder %s428_s23, %s428_s23 }
  0x5c   : > { %p3858_p10 = scmp.ne.s32.totalorder %s428_s23, %s3857_s28  ;;  %p3866_p0 = scmp.lt.s32.totalorder %s3857_s28, %s3857_s28 }
  0x5e   : > { %p3860_p11 = pnand %p3858_p10, %p4240_p8  ;;  %p3867_p2 = por %p3866_p0, %p3865_p13 }
  0x60   : > { %p3861_p12 = pneg %p3860_p11 }
  0x62   : > { %p3868_p5 = pnand %p3867_p2, %p3861_p12 }
  0x64   : > { %3871 = shalt.err (!%p3868_p5)
}
  0x65   : > { %s4087_s20 = smov 256   ;;  %s4088_s8 = smov 16  }
  0x66   : > { %3510 = dma.hbm_to_vmem [thread:$0]  (!%p4224_p6), %s4873_s9, 4096, %s428_s23, [#allocation12], %s4087_s20, %s4087_s20, %s4088_s8  }
  0x67   : > { %s4089_s24 = smov [#allocation7]   ;;  %s4090_s17 = smov [#allocation10]  }
  0x68   : > { %s379_s12 = sshll.u32 %s4089_s24, 4  ;;  %s405_s22 = sshll.u32 %s4090_s17, 4  ;;  %s380_s12 = int_to_ptr.vmem [resolvable:$true] %s379_s12  ;;  %s406_s22 = int_to_ptr.vmem [resolvable:$true] %s405_s22 }
  0x69   : > { %s3872_s18 = scalar_lea.hbm %s4866_s2, 16 }
  0x6a   : > { %p3873_p7 = scmp.ne.s32.totalorder %s4866_s2, %s3872_s18  ;;  %p3879_p1 = scmp.lt.u32.totalorder %s3872_s18, %s4866_s2 }
  0x6c   : > { %p3875_p9 = pnand %p3873_p7, %p4240_p8 }
  0x6e   : > { %p3876_p4 = pneg %p3875_p9 }
  0x70   : > { %p3881_p3 = pnand %p3879_p1, %p3876_p4 }
  0x72   : > { %3884 = shalt.err (!%p3881_p3)
}
  0x73   : > { %s3885_s23 = scalar_lea.vmem %s380_s12, 16  ;;  %s3892_s20 = scalar_lea.vmem %s380_s12, 32 }
  0x74   : > { %p3886_p10 = scmp.ne.s32.totalorder %s380_s12, %s3885_s23  ;;  %p3893_p13 = scmp.lt.s32.totalorder %s380_s12, %s380_s12 }
  0x75   : > { %p3894_p0 = scmp.lt.s32.totalorder %s3892_s20, %s3885_s23 }
  0x76   : > { %p3888_p11 = pnand %p3886_p10, %p4240_p8 }
  0x77   : > { %p3895_p2 = por %p3894_p0, %p3893_p13 }
  0x78   : > { %p3889_p12 = pneg %p3888_p11 }
  0x7a   : > { %p3896_p5 = pnand %p3895_p2, %p3889_p12 }
  0x7c   : > { %3899 = shalt.err (!%p3896_p5)
}
  0x7d   : > { %3501 = dma.hbm_to_vmem [thread:$0]  (!%p4224_p6), %s4866_s2, 16, %s380_s12, [#allocation6]  }
  0x7e   : > { %s3900_s1 = scalar_lea.hbm %s4869_s5, 1024 }
  0x7f   : > { %p3901_p7 = scmp.ne.s32.totalorder %s4869_s5, %s3900_s1  ;;  %p3907_p1 = scmp.lt.u32.totalorder %s3900_s1, %s4869_s5 }
  0x81   : > { %p3903_p9 = pnand %p3901_p7, %p4240_p8 }
  0x83   : > { %p3904_p4 = pneg %p3903_p9 }
  0x85   : > { %p3909_p3 = pnand %p3907_p1, %p3904_p4 }
  0x87   : > { %3912 = shalt.err (!%p3909_p3)
}
  0x88   : > { %s3913_s13 = scalar_lea.vmem %s406_s22, 1024  ;;  %p3921_p13 = scmp.lt.s32.totalorder %s406_s22, %s406_s22 }
  0x89   : > { %p3914_p10 = scmp.ne.s32.totalorder %s406_s22, %s3913_s13  ;;  %p3922_p0 = scmp.lt.s32.totalorder %s3913_s13, %s3913_s13 }
  0x8b   : > { %p3916_p11 = pnand %p3914_p10, %p4240_p8  ;;  %p3923_p2 = por %p3922_p0, %p3921_p13 }
  0x8d   : > { %p3917_p12 = pneg %p3916_p11 }
  0x8f   : > { %p3924_p5 = pnand %p3923_p2, %p3917_p12 }
  0x91   : > { %3927 = shalt.err (!%p3924_p5)
}
  0x92   : > { %s4091_s12 = smov 64   ;;  %s4092_s18 = smov 4  }
  0x93   : > { %3507 = dma.hbm_to_vmem [thread:$0]  (!%p4224_p6), %s4869_s5, 1024, %s406_s22, [#allocation9], %s4091_s12, %s4091_s12, %s4092_s18  }
  0x94   : > { %s4093_s20 = smov [#allocation13]   ;;  %s3928_s7 = scalar_lea.hbm %s4875_s11, 4096 }
  0x95   : > { %s443_s3 = sshll.u32 %s4093_s20, 4  ;;  %p3929_p7 = scmp.ne.s32.totalorder %s4875_s11, %s3928_s7  ;;  %s444_s3 = int_to_ptr.vmem [resolvable:$true] %s443_s3 }
  0x96   : > { %p3935_p1 = scmp.lt.u32.totalorder %s3928_s7, %s4875_s11 }
  0x97   : > { %p3931_p9 = pnand %p3929_p7, %p4240_p8 }
  0x99   : > { %p3932_p4 = pneg %p3931_p9 }
  0x9b   : > { %p3937_p3 = pnand %p3935_p1, %p3932_p4 }
  0x9d   : > { %3940 = shalt.err (!%p3937_p3)
}
  0x9e   : > { %s3941_s22 = scalar_lea.vmem %s444_s3, 4096  ;;  %p3949_p13 = scmp.lt.s32.totalorder %s444_s3, %s444_s3 }
  0x9f   : > { %p3942_p10 = scmp.ne.s32.totalorder %s444_s3, %s3941_s22  ;;  %p3950_p0 = scmp.lt.s32.totalorder %s3941_s22, %s3941_s22 }
  0xa1   : > { %p3944_p11 = pnand %p3942_p10, %p4240_p8  ;;  %p3951_p2 = por %p3950_p0, %p3949_p13 }
  0xa3   : > { %p3945_p12 = pneg %p3944_p11 }
  0xa5   : > { %p3952_p5 = pnand %p3951_p2, %p3945_p12 }
  0xa7   : > { %3955 = shalt.err (!%p3952_p5)
}
  0xa8   : > { %3513 = dma.hbm_to_vmem [thread:$0]  (!%p4224_p6), %s4875_s11, 4096, %s444_s3, [#allocation12], %s4091_s12, %s4091_s12, %s4092_s18  }
  0xa9   : > { %s3163_s19 = sadd.s32 4294967294, %s4080_s30   ;;  %s44_s28 = sadd.s32 1, %s4076_s29 }
  0xaa   : > { %p46_p8 = scmp.ge.s32.totalorder %s44_s28, 2  ;;  %s51_s21 = sadd.s32 1, %s4068_s27 }
  0xab   : > { %p58_p7 = scmp.ne.s32.totalorder %s4068_s27, %s4064_s26  ;;  %p59_p9 = scmp.eq.s32.totalorder %s4080_s30, 0 }
  0xac   : > { %s4925_s28 = smov (%p46_p8, %s44_s28), 0  ;;  %p64_p1 = scmp.ne.s32.totalorder %s4064_s26, %s4060_s25 }
  0xad   : > { %p4360_p4 = por %p59_p9, %p58_p7  ;;  %s48_s12 = ssub.s32 %s4076_s29, %s4925_s28 }
  0xae   : > { %s4900_s18 = sadd.s32 4294967295, %s4080_s30   ;;  %p49_p3 = scmp.eq.s32.totalorder %s48_s12, 0 }
  0xaf   : > { %p342_p6 = scmp.eq.s32.totalorder %s4900_s18, 1  ;;  %p4901_p10 = scmp.ne.s32.totalorder %s4893_s15, 0 }
  0xb0   : > { %p348_p13 = scmp.eq.s32.totalorder %s3163_s19, 1  ;;  %p3528_p2 = scmp.lt.s32.totalorder %s4080_s30, 2 }
  0xb1   : > { %p4372_p11 = por %p4901_p10, %p64_p1  ;;  %p4376_p12 = por %p342_p6, %p58_p7 }
  0xb2   : > { %s4381_s8 = scalar_select %p49_p3, %s4068_s27, %s51_s21  }
  0xb3   : > { %s4903_s3 = scalar_select %p4376_p12, 1, 0 }
  0xb4   : > { %p4383_p0 = por %p348_p13, %p64_p1  ;;  %s460_s7 = sand.u32 1, %s4068_s27  }
  0xb5   : > { %s3331_s1 = sshll.u32 %s4076_s29, 8  ;;  %s3172_s10 = sshll.u32 %s460_s7, 4 }
  0xb6   : > { %s4904_s6 = scalar_select %p4383_p0, 1, 0 }
  0xb7   : > { %s4393_s22 = scalar_lea.hbm %s4864_s0, %s3331_s1  ;;  %s464_s14 = scalar_lea.vmem [#allocation2], %s3172_s10 }
  0xb8   : > { %s471_s13 = sshll.u32 %s464_s14, 4  ;;  %p4397_p5 = pnand %p3528_p2, %p4360_p4  ;;  %s4401_s13 = int_to_ptr.vmem [resolvable:$true] %s471_s13 }
  0xb9   : > { %s4403_s21 = scalar_lea.sflag [#allocation3], %s460_s7  ;;  %s3956_s12 = scalar_lea.hbm %s4393_s22, 256 }
  0xba   : > { %p3957_p8 = scmp.ne.s32.totalorder %s4393_s22, %s3956_s12  ;;  %p3958_p7 = pneg %p4397_p5 }
  0xbb   : > { %s3961_s1 = scalar_lea.hbm %s4864_s0, 512  ;;  %p3962_p4 = scmp.lt.u32.totalorder %s4393_s22, %s4864_s0 }
  0xbc   : > { %p3959_p9 = pnand %p3958_p7, %p3957_p8  ;;  %p3963_p6 = scmp.lt.u32.totalorder %s3961_s1, %s3956_s12 }
  0xbd   : > { %p3965_p10 = scmp.lt.u32.totalorder %s3956_s12, %s4393_s22 }
  0xbe   : > { %p3960_p1 = pneg %p3959_p9  ;;  %p3964_p3 = por %p3963_p6, %p3962_p4 }
  0xc0   : > { %p3966_p13 = por %p3965_p10, %p3964_p3 }
  0xc2   : > { %p3967_p2 = pnand %p3966_p13, %p3960_p1 }
  0xc4   : > { %3970 = shalt.err (!%p3967_p2)
}
  0xc5   : > { %s3971_s7 = scalar_lea.vmem %s4401_s13, 256  ;;  %s4094_s17 = smov [#allocation2]  }
  0xc6   : > { %p3972_p8 = scmp.ne.s32.totalorder %s4401_s13, %s3971_s7  ;;  %s3976_s14 = sshll.u32 %s4094_s17, 4  ;;  %s3977_s14 = int_to_ptr.vmem [resolvable:$false] %s3976_s14 }
  0xc7   : > { %s3978_s18 = scalar_lea.vmem %s3977_s14, 512  ;;  %p3979_p12 = scmp.lt.s32.totalorder %s4401_s13, %s3977_s14 }
  0xc8   : > { %p3974_p9 = pnand %p3972_p8, %p3958_p7  ;;  %p3980_p4 = scmp.lt.s32.totalorder %s3978_s18, %s3971_s7 }
  0xca   : > { %p3975_p0 = pneg %p3974_p9  ;;  %p3981_p6 = por %p3980_p4, %p3979_p12 }
  0xcc   : > { %p3982_p3 = pnand %p3981_p6, %p3975_p0 }
  0xce   : > { %3985 = shalt.err (!%p3982_p3)
}
  0xcf   : > { %s4095_s12 = smov 128   ;;  %s4096_s23 = smov 8  }
  0xd0   : > { %3517 = dma.hbm_to_vmem [thread:$0]  (!%p4397_p5), %s4393_s22, 256, %s4401_s13, %s4403_s21, %s4095_s12, %s4095_s12, %s4096_s23  }
  0xd1   : > { %p4906_p7 = scmp.ne.s32.totalorder %s4894_s16, 0 }
  0xd2   : > { %s4434_s1 = sand.u32 (!%p4906_p7), 1, %s4064_s26  }
  0xd3   : > { %483 = sbr.rel (%p4906_p7) target bundleno = 2882 (0xb42), region = 72  ;;  %s3176_s10 = sshll.u32 (!%p4906_p7), %s4434_s1, 4 }
  0xd4   : > { %s486_s24 = scalar_lea.sflag (!%p4906_p7), [#allocation3], %s4434_s1  ;;  %s4440_s7 = scalar_lea.vmem (!%p4906_p7), [#allocation2], %s3176_s10 }
  0xda   : > { %4039 = dma.done.wait (%p4372_p11), %s486_s24, 256  }
  0xdb   : > { %4041 = vsyncadd (%p4372_p11), %s486_s24, 4294967040  ;;  %p4907_p12 = scmp.ne.s32.totalorder %s4893_s15, 0 }
  0xdd   : > { %4043 = dma.done.wait (%p4907_p12), [#allocation6], 32  }
  0xde   : > { %4045 = vsyncadd (%p4907_p12), [#allocation6], 4294967264 }
  0xdf   : > { %4047 = dma.done.wait (%p4907_p12), [#allocation9], 4096  }
  0xe0   : > { %4049 = vsyncadd (%p4907_p12), [#allocation9], 4294963200 }
  0xe1   : > { %4051 = dma.done.wait (%p4907_p12), [#allocation12], 8192  }
  0xe2   : > { %4053 = vsyncadd (%p4907_p12), [#allocation12], 4294959104  ;;  %v562_v0 = vld [vmem:[%s4440_s7] sm:$0xff]  ;;  %v563_v1 = vld [vmem:[%s4440_s7 + $0x8] sm:$0xff]  ;;  %v4097_v5 = vmov 0.0   ;;  %v4098_v37 = vmov 0  }
  0xe3   : > { %566 = vadd.xlane.f32.xlu0 %v562_v0  ;;  %606 = vadd.xlane.f32.xlu1 %v562_v0  ;;  %v3606_v2 = vld [vmem:[#allocation8 + $0x8] ss:$12 sps:$4 sm:$0xff]   ;;  %v3607_v3 = vld [vmem:[#allocation8 + $0x4] ss:$12 sps:$4 sm:$0xff]   ;;  %v3609_v4 = vld [vmem:[#allocation8 + $0x20] ss:$12 sps:$4 sm:$0xff]  }
  0xe4   : > { %774 = vmatprep.subr.bf16.mxu0 %v3606_v2  ;;  %3403 = vmatprep.subr.bf16.mxu1 %v4097_v5  ;;  %v3610_v22 = vld [vmem:[#allocation8 + $0x1c] ss:$12 sps:$4 sm:$0xff]   ;;  %v3612_v23 = vld [vmem:[#allocation8] ss:$12 sps:$4 sm:$0xff]   ;;  %v3613_v24 = vld [vmem:[#allocation8 + $0x38] ss:$12 sps:$4 sm:$0xff]  }
  0xe5   : > { %775 = vmatpush1.bf16.msra.mxu0 %v3607_v3  ;;  %3404 = vmatpush3.bf16.msra.mxu1 %v3612_v23  ;;  %v3614_v25 = vld [vmem:[#allocation8 + $0x34] ss:$12 sps:$4 sm:$0xff]   ;;  %v3616_v26 = vld [vmem:[#allocation8 + $0x18] ss:$12 sps:$4 sm:$0xff]   ;;  %v3617_v27 = vld [vmem:[#allocation8 + $0x50] ss:$12 sps:$4 sm:$0xff]  }
  0xe6   : > { %776 = vmatprep.subr.bf16.mxu0 %v3609_v4  ;;  %3405 = vmatprep.subr.bf16.mxu1 %v4097_v5  ;;  %v3618_v28 = vld [vmem:[#allocation8 + $0x4c] ss:$12 sps:$4 sm:$0xff]   ;;  %v3620_v29 = vld [vmem:[#allocation8 + $0x30] ss:$12 sps:$4 sm:$0xff]   ;;  %v3621_v30 = vld [vmem:[#allocation8 + $0x68] ss:$12 sps:$4 sm:$0xff]  }
  0xe7   : > { %568 = vadd.xlane.f32.xlu0 %v563_v1  ;;  %608 = vadd.xlane.f32.xlu1 %v563_v1  ;;  %v3622_v31 = vld [vmem:[#allocation8 + $0x64] ss:$12 sps:$4 sm:$0xff]   ;;  %v3624_v32 = vld [vmem:[#allocation8 + $0x48] ss:$12 sps:$4 sm:$0xff]   ;;  %v3625_v33 = vld [vmem:[#allocation8 + $0x80] ss:$12 sps:$4 sm:$0xff]  }
  0xe8   : > { %v3626_v34 = vld [vmem:[#allocation8 + $0x7c] ss:$12 sps:$4 sm:$0xff]   ;;  %v3628_v35 = vld [vmem:[#allocation8 + $0x60] ss:$12 sps:$4 sm:$0xff]   ;;  %v3629_v36 = vld [vmem:[#allocation8 + $0x98] ss:$12 sps:$4 sm:$0xff]   ;;  %806 = vmatprep.mubr.bf16.mxu0 %v4098_v37 }
  0xe9   : > { %777 = vmatpush1.bf16.msra.mxu0 %v3610_v22  ;;  %3406 = vmatpush3.bf16.msra.mxu1 %v3616_v26  ;;  %v3630_v38 = vld [vmem:[#allocation8 + $0x94] ss:$12 sps:$4 sm:$0xff]   ;;  %v3632_v39 = vld [vmem:[#allocation8 + $0x78] ss:$12 sps:$4 sm:$0xff]   ;;  %v3633_v40 = vld [vmem:[#allocation8 + $0xb0] ss:$12 sps:$4 sm:$0xff]  }
  0xea   : > { %778 = vmatprep.subr.bf16.mxu0 %v3613_v24  ;;  %3407 = vmatprep.subr.bf16.mxu1 %v4097_v5  ;;  %v3634_v41 = vld [vmem:[#allocation8 + $0xac] ss:$12 sps:$4 sm:$0xff]   ;;  %v3636_v42 = vld [vmem:[#allocation8 + $0x90] ss:$12 sps:$4 sm:$0xff]   ;;  %v3637_v43 = vld [vmem:[#allocation8 + $0xa8] ss:$12 sps:$4 sm:$0xff]  }
  0xeb   : > { %vm4099_vm0 = vmmov 0   ;;  %v3184_v58 = vld [vmem:[#allocation5] ss:$0 sm:$0xff]  ;;  %s4100_s20 = smov 64   ;;  %vm1677_vm1 = vcmask 523264   ;;  %vm1772_vm2 = vcmask 130048  }
  0xec   : > { %3419 = vmatprep.mubr.msk.bf16.mxu1 %vm4099_vm0, %v4097_v5  ;;  %s4908_s19 = sld [smem:[#allocation23_spill]]  ;;  %s4909_s14 = sld [smem:[#allocation24_spill]] }
  0xed   : > { %779 = vmatpush1.bf16.msra.mxu0 %v3614_v25  ;;  %3408 = vmatpush3.bf16.msra.mxu1 %v3620_v29  ;;  %s4910_s23 = sld [smem:[#allocation25_spill]]  ;;  %s4911_s15 = sld [smem:[#allocation26_spill]] }
  0xee   : > { %780 = vmatprep.subr.bf16.mxu0 %v3617_v27  ;;  %3409 = vmatprep.subr.bf16.mxu1 %v4097_v5  ;;  %s4912_s22 = sld [smem:[#allocation27_spill]]  ;;  %s4913_s13 = sld [smem:[#allocation20_spill]] }
  0xef   : > { %s4914_s12 = sld [smem:[#allocation28_spill]]  ;;  %p4915_p0 = scmp.ne.s32.totalorder %s4903_s3, 0 }
  0xf1   : > { %781 = vmatpush1.bf16.msra.mxu0 %v3618_v28  ;;  %3410 = vmatpush3.bf16.msra.mxu1 %v3624_v32  ;;  %v4101_v32 = vmov 1983009808  }
  0xf2   : > { %782 = vmatprep.subr.bf16.mxu0 %v3621_v30  ;;  %3411 = vmatprep.subr.bf16.mxu1 %v4097_v5 }
  0xf4   : > { %s3332_s17 = sshll.u32 %s4913_s13, 8 }
  0xf5   : > { %783 = vmatpush1.bf16.msra.mxu0 %v3622_v31  ;;  %3412 = vmatpush3.bf16.msra.mxu1 %v3628_v35  ;;  %v4102_v35 = vmov 1934713408  }
  0xf6   : > { %784 = vmatprep.subr.bf16.mxu0 %v3625_v33  ;;  %3413 = vmatprep.subr.bf16.mxu1 %v4097_v5  ;;  %v905_v33 = vunpack.c.l.s4 %v4101_v32 }
  0xf9   : > { %785 = vmatpush1.bf16.msra.mxu0 %v3626_v34  ;;  %3414 = vmatpush3.bf16.msra.mxu1 %v3632_v39  ;;  %v906_v34 = vunpack.c.0.s8 %v905_v33 }
  0xfa   : > { %786 = vmatprep.subr.bf16.mxu0 %v3629_v36  ;;  %3415 = vmatprep.subr.bf16.mxu1 %v4097_v5  ;;  %v936_v36 = vunpack.c.l.s4 %v4102_v35 }
  0xfc   : > { %v937_v39 = vunpack.c.0.s8 %v936_v36 }
  0xfd   : > { %787 = vmatpush1.bf16.msra.mxu0 %v3630_v38  ;;  %3416 = vmatpush3.bf16.msra.mxu1 %v3636_v42 }
  0xfe   : > { %788 = vmatprep.subr.bf16.mxu0 %v3633_v40  ;;  %3417 = vmatprep.subr.bf16.mxu1 %v4097_v5 }
 0x101   : > { %789 = vmatpush1.bf16.msra.mxu0 %v3634_v41  ;;  %3418 = vmatpush3.bf16.msra.mxu1 %v3637_v43 }
 0x102   : > { %3447 = vmatprep.subr.bf16.mxu0 %v4097_v5  ;;  %3423 = vmatprep.subr.bf16.mxu1 %v4097_v5 }
 0x170   : > { %v567_v6 = vpop.xlane.xlu0 %566  ;;  %v607_v7 = vpop.xlane.xlu1 %606 }
 0x171   : > { %v571_v8 = vmul.f32 0.0078125, %v567_v6  ;;  %v610_v9 = vmul.f32 0.0078125, %v607_v7 }
 0x173   : > { %v4461_v10 = vsub.f32 %v562_v0, %v571_v8  ;;  %v4463_v11 = vsub.f32 %v562_v0, %v610_v9  ;;  %v3185_v0 = vld [vmem:[#allocation7] ss:$0 sm:$0xff] }
 0x174   : > { %v569_v12 = vpop.xlane.xlu0 %568  ;;  %v609_v13 = vpop.xlane.xlu1 %608 }
 0x175   : > { %v572_v14 = vmul.f32 0.0078125, %v569_v12  ;;  %v575_v15 = vmul.f32 %v4461_v10, %v4461_v10  ;;  %v611_v16 = vmul.f32 0.0078125, %v609_v13  ;;  %v614_v19 = vmul.f32 %v4463_v11, %v4463_v11 }
 0x177   : > { %v4467_v17 = vsub.f32 %v563_v1, %v572_v14  ;;  %577 = vadd.xlane.f32.xlu0 %v575_v15  ;;  %v4469_v18 = vsub.f32 %v563_v1, %v611_v16  ;;  %v4502_v15 = vld [vmem:[%s4868_s4] sm:$0x7] }
 0x178   : > { %v667_v16 = vrot.slane %v4502_v15, 1 }
 0x179   : > { %v576_v20 = vmul.f32 %v4467_v17, %v4467_v17  ;;  %v615_v21 = vmul.f32 %v4469_v18, %v4469_v18 }
 0x17b   : > { %579 = vadd.xlane.f32.xlu1 %v576_v20  ;;  %616 = vadd.xlane.f32.xlu0 %v614_v19 }
 0x17f   : > { %618 = vadd.xlane.f32.xlu1 %v615_v21 }
 0x204   : > { %v578_v44 = vpop.xlane.xlu0 %577 }
 0x205   : > { %v581_v45 = vmul.f32 0.0078125, %v578_v44 }
 0x207   : > { %v583_v46 = vadd.f32 1e-05, %v581_v45 }
 0x208   : > { %v617_v47 = vpop.xlane.xlu0 %616  ;;  %v580_v48 = vpop.xlane.xlu1 %579 }
 0x209   : > { %3726 = vrsqrt.f32 %v583_v46  ;;  %v620_v49 = vmul.f32 0.0078125, %v617_v47  ;;  %v582_v50 = vmul.f32 0.0078125, %v580_v48 }
 0x20b   : > { %v622_v51 = vadd.f32 1e-05, %v620_v49  ;;  %v584_v52 = vadd.f32 1e-05, %v582_v50 }
 0x20c   : > { %v619_v53 = vpop.xlane.xlu1 %618 }
 0x20d   : > { %3728 = vrsqrt.f32 %v622_v51  ;;  %v621_v54 = vmul.f32 0.0078125, %v619_v53 }
 0x20e   : > { %3730 = vrsqrt.f32 %v584_v52 }
 0x20f   : > { %v623_v55 = vadd.f32 1e-05, %v621_v54 }
 0x211   : > { %3732 = vrsqrt.f32 %v623_v55 }
 0x213   : > { %v3727_v56 = vpop.eup %3726 }
 0x214   : > { %v587_v57 = vmul.f32 %v3727_v56, %v4461_v10 }
 0x216   : > { %v595_v63 = vmul.f32 %v3184_v58, %v587_v57 }
 0x217   : > { %v3729_v59 = vpop.eup %3728 }
 0x218   : > { %v3731_v60 = vpop.eup %3730  ;;  %v626_v61 = vmul.f32 %v3729_v59, %v4463_v11  ;;  %v603_v6 = vadd.f32 %v3185_v0, %v595_v63  ;;  %v668_v11 = vlaneseq }
 0x219   : > { %v588_v62 = vmul.f32 %v3731_v60, %v4467_v17 }
 0x21a   : > { %v628_v4 = vmul.f32 %v3184_v58, %v626_v61  ;;  %v4497_v14 = vshrl.u32 %v668_v11, 7 }
 0x21b   : > { %v3733_v1 = vpop.eup %3732  ;;  %v596_v2 = vmul.f32 %v3184_v58, %v588_v62 }
 0x21c   : > { %v627_v3 = vmul.f32 %v3733_v1, %v4469_v18  ;;  %v630_v12 = vadd.f32 %v3185_v0, %v628_v4  ;;  %v4506_v17 = vsub.s32 0, %v4497_v14  ;;  %v4522_v38 = vsub.s32 %v906_v34, %v4497_v14 }
 0x21d   : > { %v604_v7 = vadd.f32 %v3185_v0, %v596_v2  ;;  %v4528_v44 = vsub.s32 %v937_v39, %v4497_v14 }
 0x21e   : > { %v629_v8 = vmul.f32 %v3184_v58, %v627_v3  ;;  %v671_v18 = vrot.slane %v667_v16, %v4506_v17  ;;  %v820_v25 = vrot.slane %v4502_v15, %v4506_v17 }
 0x21f   : > { %v605_v9 = vpack.c.bf16 %v604_v7, %v603_v6 }
 0x220   : > { %v631_v10 = vadd.f32 %v3185_v0, %v629_v8 }
 0x221   : > { %807 = vmatmul.mubr.bf16.vlgmr.msra.gmra.mrb[0].mxu0 %v605_v9 }
 0x222   : > { %v632_v13 = vpack.c.bf16 %v631_v10, %v630_v12  ;;  %3463 = vmatprep.mubr.msk.bf16.mxu0 %vm4099_vm0, %v4097_v5 }
 0x224   : > { %3420 = vmatmul.mubr.bf16.vlgmr.msra.gmra.mrb[0].mxu1 %v632_v13 }
 0x225   : > { %3425 = vmatprep.mubr.msk.bf16.mxu1 %vm4099_vm0, %v4097_v5 }
 0x2f4   : > { %v808_v19 = vpop.f32.mrb[0].mxu0 }
 0x2f5   : > { %v809_v20 = vadd.f32 %v808_v19, %v671_v18  ;;  %v4511_v21 = vpop.f32.mrb[1].mxu0 }
 0x2f6   : > { %v812_v22 = vpop.f32.mrb[2].mxu0 }
 0x2f7   : > { %v813_v23 = vadd.f32 %v812_v22, %v671_v18  ;;  %v4513_v24 = vpop.f32.mrb[3].mxu0  ;;  %1157 = vrot.lane.b32.xlu0 %v809_v20, %s4100_s20  ;;  %v888_v26 = vpop.f32.mrb[0].mxu1  ;;  %v1163_v40 = vcombine.high %v809_v20, %v4097_v5  ;;  %v1170_v45 = vrot.slane %v809_v20, %v4522_v38 }
 0x2f8   : > { %v3421_v27 = vpop.f32.mrb[1].mxu1  ;;  %v889_v30 = vadd.f32 %v888_v26, %v820_v25 }
 0x2f9   : > { %1159 = vrot.lane.b32.xlu1 %v813_v23, %s4100_s20  ;;  %v891_v28 = vpop.f32.mrb[2].mxu1  ;;  %v1229_v41 = vcombine.high %v813_v23, %v4097_v5  ;;  %v1177_v48 = vrot.slane %v1163_v40, %v4522_v38  ;;  %v1236_v49 = vrot.slane %v813_v23, %v4522_v38 }
 0x2fa   : > { %v3422_v29 = vpop.f32.mrb[3].mxu1  ;;  %v892_v31 = vadd.f32 %v891_v28, %v820_v25  ;;  %v903_v42 = vcombine.high %v889_v30, %v4097_v5  ;;  %v910_v56 = vrot.slane %v889_v30, %v4522_v38 }
 0x2fb   : > { %v1243_v50 = vrot.slane %v1229_v41, %v4522_v38 }
 0x2fc   : > { %v4540_v57 = vrot.slane %v903_v42, %v4522_v38  ;;  %v969_v58 = vcombine.high %v892_v31, %v4097_v5  ;;  %v976_v0 = vrot.slane %v892_v31, %v4522_v38 }
 0x2fd   : > { %897 = vrot.lane.b32.xlu1 %v889_v30, %s4100_s20 }
 0x2fe   : > { %v983_v23 = vrot.slane %v969_v58, %v4522_v38 }
 0x301   : > { %899 = vrot.lane.b32.xlu1 %v892_v31, %s4100_s20 }
 0x369   : > { %v1158_v43 = vpop.permute.xlu0 %1157 }
 0x36a   : > { %v1178_v46 = vcombine.high %v1158_v43, %v4097_v5  ;;  %v1185_v47 = vrot.slane %v1158_v43, %v4522_v38 }
 0x36b   : > { %v1160_v51 = vpop.permute.xlu1 %1159 }
 0x36c   : > { %v1192_v52 = vrot.slane %v1178_v46, %v4522_v38  ;;  %v1193_v53 = vcombine.low %v1170_v45, %v1185_v47  ;;  %v1194_v54 = vcombine.high %v1170_v45, %v1185_v47  ;;  %v1244_v55 = vcombine.high %v1160_v51, %v4097_v5 }
 0x36d   : > { %v1251_v59 = vrot.slane %v1160_v51, %v4522_v38 }
 0x36e   : > { %v1201_v60 = vrot.slane %v1193_v53, %v4528_v44  ;;  %v1208_v61 = vrot.slane %v1194_v54, %v4528_v44  ;;  %v1209_v62 = vcombine.low %v1177_v48, %v1192_v52  ;;  %v1210_v63 = vcombine.high %v1177_v48, %v1192_v52 }
 0x36f   : > { %v1258_v1 = vrot.slane %v1244_v55, %v4522_v38  ;;  %v1259_v2 = vcombine.low %v1236_v49, %v1251_v59  ;;  %v1260_v3 = vcombine.high %v1236_v49, %v1251_v59  ;;  %v898_v4 = vpop.permute.xlu1 %897 }
 0x370   : > { %v1217_v6 = vrot.slane %v1209_v62, %v4528_v44  ;;  %v1224_v7 = vrot.slane %v1210_v63, %v4528_v44  ;;  %v1225_v8 = vcombine.high %v1201_v60, %v4097_v5  ;;  %v1226_v9 = vcombine.high %v1208_v61, %v4097_v5 }
 0x371   : > { %v1267_v12 = vrot.slane %v1259_v2, %v4528_v44  ;;  %v1274_v10 = vrot.slane %v1260_v3, %v4528_v44  ;;  %v1275_v13 = vcombine.low %v1243_v50, %v1258_v1  ;;  %v1276_v11 = vcombine.high %v1243_v50, %v1258_v1 }
 0x372   : > { %v1227_v18 = vcombine.high %v1217_v6, %v4097_v5  ;;  %v1228_v19 = vcombine.high %v1224_v7, %v4097_v5  ;;  %v3218_v20 = vpack.c.bf16 %v1217_v6, %v1201_v60  ;;  %v3219_v22 = vpack.c.bf16 %v1224_v7, %v1208_v61 }
 0x373   : > { %v1283_v25 = vrot.slane %v1275_v13, %v4528_v44  ;;  %v1290_v26 = vrot.slane %v1276_v11, %v4528_v44  ;;  %v1291_v27 = vcombine.high %v1267_v12, %v4097_v5  ;;  %v1292_v31 = vcombine.high %v1274_v10, %v4097_v5  ;;  %v900_v36 = vpop.permute.xlu1 %899 }
 0x374   : > { %v4561_v28 = vrot.slane %v3218_v20, %v4522_v38  ;;  %v3222_v29 = vpack.c.bf16 %v1227_v18, %v1225_v8  ;;  %v3223_v30 = vpack.c.bf16 %v1228_v19, %v1226_v9  ;;  %v1326_v39 = vrot.slane %v3219_v22, %v4522_v38 }
 0x375   : > { %v1293_v32 = vcombine.high %v1283_v25, %v4097_v5  ;;  %v1294_v33 = vcombine.high %v1290_v26, %v4097_v5  ;;  %v3220_v34 = vpack.c.bf16 %v1283_v25, %v1267_v12  ;;  %v3221_v35 = vpack.c.bf16 %v1290_v26, %v1274_v10 }
 0x376   : > { %v4568_v40 = vrot.slane %v3222_v29, %v4522_v38  ;;  %v918_v41 = vcombine.high %v898_v4, %v4097_v5  ;;  %v925_v42 = vrot.slane %v898_v4, %v4522_v38  ;;  %v4573_v43 = vrot.slane %v3223_v30, %v4522_v38 }
 0x377   : > { %v1334_v45 = vrot.slane %v3220_v34, %v4522_v38  ;;  %v3224_v46 = vpack.c.bf16 %v1293_v32, %v1291_v27  ;;  %v3225_v47 = vpack.c.bf16 %v1294_v33, %v1292_v31  ;;  %v984_v51 = vcombine.high %v900_v36, %v4097_v5 }
 0x378   : > { %v932_v48 = vrot.slane %v918_v41, %v4522_v38  ;;  %v933_v49 = vcombine.low %v910_v56, %v925_v42  ;;  %v934_v50 = vcombine.high %v910_v56, %v925_v42  ;;  %v1342_v52 = vrot.slane %v3221_v35, %v4522_v38 }
 0x379   : > { %v1383_v53 = vrot.slane %v3224_v46, %v4522_v38  ;;  %v1391_v54 = vrot.slane %v3225_v47, %v4522_v38  ;;  %v991_v55 = vrot.slane %v900_v36, %v4522_v38  ;;  %v998_v56 = vrot.slane %v984_v51, %v4522_v38 }
 0x37a   : > { %v941_v58 = vrot.slane %v933_v49, %v4528_v44  ;;  %v948_v59 = vrot.slane %v934_v50, %v4528_v44  ;;  %v949_v60 = vcombine.low %v4540_v57, %v932_v48  ;;  %v950_v61 = vcombine.high %v4540_v57, %v932_v48 }
 0x37b   : > { %v999_v62 = vcombine.low %v976_v0, %v991_v55  ;;  %v1000_v63 = vcombine.high %v976_v0, %v991_v55  ;;  %v1343_v1 = vcombine.low %v4561_v28, %v1326_v39  ;;  %v1015_v9 = vcombine.low %v983_v23, %v998_v56 }
 0x37c   : > { %v957_v2 = vrot.slane %v949_v60, %v4528_v44  ;;  %v964_v3 = vrot.slane %v950_v61, %v4528_v44  ;;  %v965_v4 = vcombine.high %v941_v58, %v4097_v5  ;;  %v966_v6 = vcombine.high %v948_v59, %v4097_v5 }
 0x37d   : > { %v1007_v7 = vrot.slane %v999_v62, %v4528_v44  ;;  %v1014_v8 = vrot.slane %v1000_v63, %v4528_v44  ;;  %v1016_v57 = vcombine.high %v983_v23, %v998_v56  ;;  %v1023_v11 = vrot.slane %v1015_v9, %v4528_v44 }
 0x37e   : > { %v967_v12 = vcombine.high %v957_v2, %v4097_v5  ;;  %v968_v0 = vcombine.high %v964_v3, %v4097_v5  ;;  %v3210_v10 = vpack.c.bf16 %v957_v2, %v941_v58  ;;  %v3211_v13 = vpack.c.bf16 %v964_v3, %v948_v59 }
 0x37f   : > { %v1030_v18 = vrot.slane %v1016_v57, %v4528_v44  ;;  %v1031_v19 = vcombine.high %v1007_v7, %v4097_v5  ;;  %v1032_v20 = vcombine.high %v1014_v8, %v4097_v5  ;;  %v1033_v27 = vcombine.high %v1023_v11, %v4097_v5 }
 0x380   : > { %v1058_v22 = vrot.slane %v3210_v10, %v4522_v38  ;;  %v1066_v25 = vrot.slane %v3211_v13, %v4522_v38  ;;  %v3214_v26 = vpack.c.bf16 %v967_v12, %v965_v4  ;;  %v3215_v23 = vpack.c.bf16 %v968_v0, %v966_v6 }
 0x381   : > { %v1034_v28 = vcombine.high %v1030_v18, %v4097_v5  ;;  %v3212_v29 = vpack.c.bf16 %v1023_v11, %v1007_v7  ;;  %v3213_v30 = vpack.c.bf16 %v1030_v18, %v1014_v8  ;;  %v1351_v34 = vcombine.low %v1334_v45, %v1342_v52 }
 0x382   : > { %v1083_v31 = vcombine.low %v1058_v22, %v1066_v25  ;;  %v1107_v32 = vrot.slane %v3214_v26, %v4522_v38  ;;  %v1115_v33 = vrot.slane %v3215_v23, %v4522_v38  ;;  %v3216_v39 = vpack.c.bf16 %v1033_v27, %v1031_v19 }
 0x383   : > { %v1074_v35 = vrot.slane %v3212_v29, %v4522_v38  ;;  %v1082_v36 = vrot.slane %v3213_v30, %v4522_v38  ;;  %v3217_v41 = vpack.c.bf16 %v1034_v28, %v1032_v20  ;;  %v1350_v46 = vrot.slane %v1343_v1, %v4528_v44 }
 0x384   : > { %v1132_v42 = vcombine.low %v1107_v32, %v1115_v33  ;;  %v1358_v47 = vrot.slane %v1351_v34, %v4528_v44  ;;  %v1392_v48 = vcombine.low %v4568_v40, %v4573_v43  ;;  %v1123_v50 = vrot.slane %v3216_v39, %v4522_v38 }
 0x385   : > { %v1091_v49 = vcombine.low %v1074_v35, %v1082_v36  ;;  %v1131_v51 = vrot.slane %v3217_v41, %v4522_v38  ;;  %v1400_v45 = vcombine.low %v1383_v53, %v1391_v54  ;;  %v1090_v52 = vrot.slane %v1083_v31, %v4528_v44 }
 0x386   : > { %v1359_v55 = vcombine.low %v1350_v46, %v1358_v47  ;;  %v1399_v60 = vrot.slane %v1392_v48, %v4528_v44  ;;  %v1139_v56 = vrot.slane %v1132_v42, %v4528_v44  ;;  %v674_v36 = vsub.s32 1, %v4497_v14 }
 0x387   : > { %v1098_v58 = vrot.slane %v1091_v49, %v4528_v44  ;;  %v1140_v59 = vcombine.low %v1123_v50, %v1131_v51  ;;  %v1407_v61 = vrot.slane %v1400_v45, %v4528_v44 }
 0x388   : > { %v1412_v53 = vshrl.u32 %v1359_v55, 16  ;;  %v675_v39 = vrot.slane %v667_v16, %v674_v36 }
 0x389   : > { %v1147_v40 = vrot.slane %v1140_v59, %v4528_v44  ;;  %v1408_v43 = vcombine.low %v1399_v60, %v1407_v61  ;;  %v1099_v62 = vcombine.low %v1090_v52, %v1098_v58 }
 0x38a   : > { %v815_v41 = vadd.f32 %v4513_v24, %v675_v39  ;;  %v811_v42 = vadd.f32 %v4511_v21, %v675_v39 }
 0x38b   : > { %v1411_v63 = vpack.i.b16 %v1408_v43, %v1359_v55  ;;  %v1148_v1 = vcombine.low %v1139_v56, %v1147_v40  ;;  %v1413_v54 = vshrl.u32 %v1408_v43, 16  ;;  %v1152_v2 = vshrl.u32 %v1099_v62, 16 }
 0x38c   : > { %v1423_v52 = vcombine.high %v811_v42, %v4097_v5  ;;  %v1430_v59 = vrot.slane %v811_v42, %v4522_v38  ;;  %v1489_v40 = vcombine.high %v815_v41, %v4097_v5 }
 0x38d   : > { %v1682_v3 = vsel %vm1677_vm1, %v1411_v63, 0  ;;  %v1151_v4 = vpack.i.b16 %v1148_v1, %v1099_v62  ;;  %v1414_v6 = vpack.i.b16 %v1413_v54, %v1412_v53  ;;  %v1153_v7 = vshrl.u32 %v1148_v1, 16 }
 0x38e   : > { %3424 = vmatpush3.bf16.xpose.msra.mxu1 %v1682_v3  ;;  %v1437_v56 = vrot.slane %v1423_v52, %v4522_v38  ;;  %v1496_v54 = vrot.slane %v815_v41, %v4522_v38 }
 0x38f   : > { %3429 = vmatprep.subr.bf16.mxu1 %v4097_v5  ;;  %v1154_v8 = vpack.i.b16 %v1153_v7, %v1152_v2  ;;  %v1729_v9 = vsel %vm1677_vm1, %v1414_v6, 0 }
 0x395   : > { %3426 = vmatmul.mubr.msk.bf16.vlgmr.msra.gmra.mrb[4].mxu1 %vm1677_vm1, %v1151_v4 }
 0x396   : > { %3430 = vmatpush3.bf16.xpose.msra.mxu1 %v1729_v9  ;;  %3431 = vmatprep.mubr.msk.bf16.mxu1 %vm4099_vm0, %v4097_v5 }
 0x397   : > { %3435 = vmatprep.subr.bf16.mxu1 %v4097_v5 }
 0x39d   : > { %3432 = vmatmul.mubr.msk.bf16.vlgmr.msra.gmra.mrb[8].mxu1 %vm1677_vm1, %v1154_v8  ;;  %v1503_v8 = vrot.slane %v1489_v40, %v4522_v38 }
 0x39e   : > { %3437 = vmatprep.mubr.msk.bf16.mxu1 %vm4099_vm0, %v4097_v5 }
 0x468   : > { %v1718_v57 = vpop.f32.mrb[4].mxu1 }
 0x469   : > { %v3427_v12 = vpop.f32.mrb[5].mxu1  ;;  %v1773_v0 = vsel %vm1772_vm2, %v1718_v57, -inf }
 0x46a   : > { %1774 = vmax.xlane.f32.xlu0 %v1773_v0  ;;  %v1721_v10 = vpop.f32.mrb[6].mxu1 }
 0x46b   : > { %v3428_v13 = vpop.f32.mrb[7].mxu1  ;;  %v1776_v11 = vsel %vm1772_vm2, %v1721_v10, -inf }
 0x46c   : > { %1777 = vmax.xlane.f32.xlu1 %v1776_v11 }
 0x470   : > { %v1765_v18 = vpop.f32.mrb[8].mxu1 }
 0x471   : > { %v3433_v19 = vpop.f32.mrb[9].mxu1  ;;  %v1779_v20 = vsel %vm1772_vm2, %v1765_v18, -inf }
 0x472   : > { %1780 = vmax.xlane.f32.xlu0 %v1779_v20  ;;  %v1768_v22 = vpop.f32.mrb[10].mxu1 }
 0x473   : > { %v3434_v25 = vpop.f32.mrb[11].mxu1  ;;  %v1782_v26 = vsel %vm1772_vm2, %v1768_v22, -inf }
 0x476   : > { %1783 = vmax.xlane.f32.xlu0 %v1782_v26 }
 0x4f7   : > { %v1775_v23 = vpop.xlane.xlu0 %1774 }
 0x4f8   : > { %v1785_v27 = vsub.f32 %v1718_v57, %v1775_v23 }
 0x4f9   : > { %v1778_v28 = vpop.xlane.xlu1 %1777 }
 0x4fa   : > { %v1789_v29 = vmul.f32 1.442695, %v1785_v27  ;;  %v1786_v30 = vsub.f32 %v1721_v10, %v1778_v28 }
 0x4fc   : > { %3734 = vpow2.f32 %v1789_v29  ;;  %v1791_v31 = vmul.f32 1.442695, %v1786_v30 }
 0x4fe   : > { %3736 = vpow2.f32 %v1791_v31 }
 0x4ff   : > { %v1781_v46 = vpop.xlane.xlu0 %1780 }
 0x500   : > { %v1787_v49 = vsub.f32 %v1765_v18, %v1781_v46 }
 0x502   : > { %v1793_v51 = vmul.f32 1.442695, %v1787_v49 }
 0x503   : > { %v1784_v47 = vpop.xlane.xlu0 %1783 }
 0x504   : > { %v1788_v48 = vsub.f32 %v1768_v22, %v1784_v47 }
 0x506   : > { %v4634_v32 = vpop.eup %3734  ;;  %v1795_v50 = vmul.f32 1.442695, %v1788_v48 }
 0x507   : > { %v1797_v33 = vsel %vm1772_vm2, %v4634_v32, 0.0 }
 0x508   : > { %v4638_v34 = vpop.eup %3736  ;;  %1798 = vadd.xlane.f32.xlu0 %v1797_v33  ;;  %3738 = vpow2.f32 %v1795_v50 }
 0x509   : > { %v1800_v35 = vsel %vm1772_vm2, %v4638_v34, 0.0  ;;  %3740 = vpow2.f32 %v1793_v51 }
 0x50a   : > { %1801 = vadd.xlane.f32.xlu1 %v1800_v35 }
 0x512   : > { %v4651_v45 = vpop.eup %3738 }
 0x513   : > { %v4653_v15 = vpop.eup %3740  ;;  %v1806_v16 = vsel %vm1772_vm2, %v4651_v45, 0.0 }
 0x514   : > { %v1803_v21 = vsel %vm1772_vm2, %v4653_v15, 0.0 }
 0x51b   : > { %1419 = vrot.lane.b32.xlu1 %v815_v41, %s4100_s20 }
 0x51e   : > { %1417 = vrot.lane.b32.xlu0 %v811_v42, %s4100_s20 }
 0x53d   : > { %1807 = vadd.xlane.f32.xlu0 %v1806_v16 }
 0x53f   : > { %1804 = vadd.xlane.f32.xlu1 %v1803_v21 }
 0x595   : > { %v1799_v24 = vpop.xlane.xlu0 %1798 }
 0x596   : > { %3742 = vrcp.f32 %v1799_v24 }
 0x597   : > { %v1802_v55 = vpop.xlane.xlu1 %1801 }
 0x598   : > { %3744 = vrcp.f32 %v1802_v55 }
 0x599   : > { %v1418_v58 = vpop.permute.xlu0 %1417 }
 0x59a   : > { %v1438_v60 = vcombine.high %v1418_v58, %v4097_v5  ;;  %v1445_v61 = vrot.slane %v1418_v58, %v4522_v38 }
 0x59b   : > { %v1420_v43 = vpop.permute.xlu1 %1419 }
 0x59c   : > { %v1452_v62 = vrot.slane %v1438_v60, %v4522_v38  ;;  %v1453_v63 = vcombine.low %v1430_v59, %v1445_v61  ;;  %v1454_v1 = vcombine.high %v1430_v59, %v1445_v61  ;;  %v1504_v53 = vcombine.high %v1420_v43, %v4097_v5 }
 0x59d   : > { %v1511_v2 = vrot.slane %v1420_v43, %v4522_v38 }
 0x59e   : > { %v1461_v3 = vrot.slane %v1453_v63, %v4528_v44  ;;  %v1468_v4 = vrot.slane %v1454_v1, %v4528_v44  ;;  %v1469_v6 = vcombine.low %v1437_v56, %v1452_v62  ;;  %v1470_v7 = vcombine.high %v1437_v56, %v1452_v62 }
 0x59f   : > { %v1518_v9 = vrot.slane %v1504_v53, %v4522_v38  ;;  %v1519_v57 = vcombine.low %v1496_v54, %v1511_v2  ;;  %v1520_v12 = vcombine.high %v1496_v54, %v1511_v2 }
 0x5a0   : > { %v1477_v0 = vrot.slane %v1469_v6, %v4528_v44  ;;  %v1484_v10 = vrot.slane %v1470_v7, %v4528_v44  ;;  %v1485_v13 = vcombine.high %v1461_v3, %v4097_v5  ;;  %v1486_v11 = vcombine.high %v1468_v4, %v4097_v5  ;;  %v3743_v61 = vpop.eup %3742 }
 0x5a1   : > { %v1527_v18 = vrot.slane %v1519_v57, %v4528_v44  ;;  %v1534_v19 = vrot.slane %v1520_v12, %v4528_v44  ;;  %v1535_v20 = vcombine.low %v1503_v8, %v1518_v9  ;;  %v1536_v27 = vcombine.high %v1503_v8, %v1518_v9 }
 0x5a2   : > { %v1487_v22 = vcombine.high %v1477_v0, %v4097_v5  ;;  %v1488_v25 = vcombine.high %v1484_v10, %v4097_v5  ;;  %v3226_v26 = vpack.c.bf16 %v1477_v0, %v1461_v3  ;;  %v3227_v23 = vpack.c.bf16 %v1484_v10, %v1468_v4  ;;  %v3745_v43 = vpop.eup %3744 }
 0x5a3   : > { %v1543_v28 = vrot.slane %v1535_v20, %v4528_v44  ;;  %v1551_v31 = vcombine.high %v1527_v18, %v4097_v5  ;;  %v1550_v35 = vrot.slane %v1536_v27, %v4528_v44  ;;  %v1552_v48 = vcombine.high %v1534_v19, %v4097_v5  ;;  %v3641_v20 = vld [vmem:[#allocation10 + $0x18] sm:$0xff]  }
 0x5a4   : > { %v3230_v29 = vpack.c.bf16 %v1487_v22, %v1485_v13  ;;  %v3231_v30 = vpack.c.bf16 %v1488_v25, %v1486_v11  ;;  %v1578_v33 = vrot.slane %v3226_v26, %v4522_v38  ;;  %v1586_v42 = vrot.slane %v3227_v23, %v4522_v38  ;;  %v3638_v11 = vld [vmem:[#allocation10] sm:$0xff]   ;;  %v3644_v22 = vld [vmem:[#allocation10 + $0x30] sm:$0xff]   ;;  %v3645_v25 = vld [vmem:[#allocation10 + $0x38] sm:$0xff]  }
 0x5a5   : > { %v1553_v39 = vcombine.high %v1543_v28, %v4097_v5  ;;  %v3228_v41 = vpack.c.bf16 %v1543_v28, %v1527_v18  ;;  %v1554_v49 = vcombine.high %v1550_v35, %v4097_v5  ;;  %v3229_v51 = vpack.c.bf16 %v1550_v35, %v1534_v19  ;;  %3448 = vmatpush3.bf16.msra.mxu0 %v3638_v11  ;;  %v3639_v18 = vld [vmem:[#allocation10 + $0x8] sm:$0xff]   ;;  %v3640_v19 = vld [vmem:[#allocation10 + $0x10] sm:$0xff]  }
 0x5a6   : > { %v1627_v46 = vrot.slane %v3230_v29, %v4522_v38  ;;  %v1635_v47 = vrot.slane %v3231_v30, %v4522_v38  ;;  %v1603_v55 = vcombine.low %v1578_v33, %v1586_v42  ;;  %v1814_v2 = vmul.f32 %v3745_v43, %v4638_v34  ;;  %3449 = vmatprep.subr.bf16.mxu0 %v4097_v5 }
 0x5a7   : > { %v1594_v50 = vrot.slane %v3228_v41, %v4522_v38  ;;  %v3232_v16 = vpack.c.bf16 %v1553_v39, %v1551_v31  ;;  %v1602_v21 = vrot.slane %v3229_v51, %v4522_v38  ;;  %v3233_v52 = vpack.c.bf16 %v1554_v49, %v1552_v48 }
 0x5a8   : > { %v1652_v60 = vcombine.low %v1627_v46, %v1635_v47  ;;  %v1610_v62 = vrot.slane %v1603_v55, %v4528_v44  ;;  %v1813_v6 = vmul.f32 %v3743_v61, %v4634_v32  ;;  %v1918_v39 = vpack.i.b16 %v4098_v37, %v4098_v37 }
 0x5a9   : > { %v1643_v24 = vrot.slane %v3232_v16, %v4522_v38  ;;  %v1611_v58 = vcombine.low %v1594_v50, %v1602_v21  ;;  %v1651_v59 = vrot.slane %v3233_v52, %v4522_v38  ;;  %3450 = vmatpush3.bf16.msra.mxu0 %v3639_v18 }
 0x5aa   : > { %v1659_v63 = vrot.slane %v1652_v60, %v4528_v44  ;;  %v1817_v8 = vpack.c.bf16 %v1814_v2, %v1813_v6  ;;  %3451 = vmatprep.subr.bf16.mxu0 %v4097_v5 }
 0x5ab   : > { %v1618_v56 = vrot.slane %v1611_v58, %v4528_v44  ;;  %v1660_v40 = vcombine.low %v1643_v24, %v1651_v59 }
 0x5ad   : > { %v1667_v1 = vrot.slane %v1660_v40, %v4528_v44  ;;  %v1619_v53 = vcombine.low %v1610_v62, %v1618_v56  ;;  %3452 = vmatpush3.bf16.msra.mxu0 %v3640_v19 }
 0x5ae   : > { %3453 = vmatprep.subr.bf16.mxu0 %v4097_v5 }
 0x5af   : > { %v1668_v54 = vcombine.low %v1659_v63, %v1667_v1  ;;  %v1673_v7 = vshrl.u32 %v1619_v53, 16 }
 0x5b1   : > { %v1671_v3 = vpack.i.b16 %v1668_v54, %v1619_v53  ;;  %v1674_v4 = vshrl.u32 %v1668_v54, 16  ;;  %3454 = vmatpush3.bf16.msra.mxu0 %v3641_v20 }
 0x5b2   : > { %3455 = vmatprep.subr.bf16.mxu0 %v4097_v5 }
 0x5b3   : > { %3436 = vmatpush3.bf16.msra.mxu1 %v1671_v3  ;;  %v1675_v9 = vpack.i.b16 %v1674_v4, %v1673_v7 }
 0x5b4   : > { %3441 = vmatprep.subr.bf16.mxu1 %v4097_v5 }
 0x5b6   : > { %3438 = vmatmul.mubr.msk.bf16.vlgmr.msra.gmra.mrb[12].mxu1 %vm1772_vm2, %v1817_v8 }
 0x5b7   : > { %3442 = vmatpush3.bf16.msra.mxu1 %v1675_v9  ;;  %3443 = vmatprep.mubr.msk.bf16.mxu1 %vm4099_vm0, %v4097_v5 }
 0x5ca   : > { %v1808_v57 = vpop.xlane.xlu0 %1807 }
 0x5cb   : > { %3746 = vrcp.f32 %v1808_v57 }
 0x5cc   : > { %v1805_v12 = vpop.xlane.xlu1 %1804 }
 0x5cd   : > { %3748 = vrcp.f32 %v1805_v12 }
 0x5d5   : > { %v3747_v34 = vpop.eup %3746 }
 0x5d6   : > { %v1816_v32 = vmul.f32 %v3747_v34, %v4651_v45  ;;  %v3642_v45 = vld [vmem:[#allocation10 + $0x20] sm:$0xff]  }
 0x5d7   : > { %v3749_v0 = vpop.eup %3748  ;;  %3456 = vmatpush3.bf16.msra.mxu0 %v3642_v45 }
 0x5d8   : > { %v1815_v10 = vmul.f32 %v3749_v0, %v4653_v15  ;;  %v3643_v15 = vld [vmem:[#allocation10 + $0x28] sm:$0xff]   ;;  %3457 = vmatprep.subr.bf16.mxu0 %v4097_v5 }
 0x5da   : > { %v1818_v13 = vpack.c.bf16 %v1816_v32, %v1815_v10 }
 0x5db   : > { %3458 = vmatpush3.bf16.msra.mxu0 %v3643_v15 }
 0x5dc   : > { %3444 = vmatmul.mubr.msk.bf16.vlgmr.msra.gmra.mrb[16].mxu1 %vm1772_vm2, %v1818_v13  ;;  %3459 = vmatprep.subr.bf16.mxu0 %v4097_v5 }
 0x5dd   : > { %2532 = vmatprep.mubr.bf16.mxu1 %v4098_v37 }
 0x5df   : > { %3460 = vmatpush3.bf16.msra.mxu0 %v3644_v22 }
 0x5e0   : > { %3461 = vmatprep.subr.bf16.mxu0 %v4097_v5 }
 0x5e3   : > { %3462 = vmatpush3.bf16.msra.mxu0 %v3645_v25 }
 0x689   : > { %v1856_v26 = vpop.f32.mrb[12].mxu1 }
 0x68a   : > { %v3439_v23 = vpop.f32.mrb[13].mxu1 }
 0x68b   : > { %v1859_v27 = vpop.f32.mrb[14].mxu1 }
 0x68c   : > { %v1907_v28 = vpack.c.bf16 %v1859_v27, %v1856_v26  ;;  %v3440_v29 = vpop.f32.mrb[15].mxu1 }
 0x68e   : > { %v1913_v42 = vshrl.u32 %v1907_v28, 16 }
 0x6af   : > { %v1900_v30 = vpop.f32.mrb[16].mxu1 }
 0x6b0   : > { %v3445_v31 = vpop.f32.mrb[17].mxu1 }
 0x6b1   : > { %v1903_v33 = vpop.f32.mrb[18].mxu1  ;;  %v3242_v31 = vld [vmem:[%s4908_s19] ss:$0 sm:$0xff]  ;;  %s555_s19 = scalar_lea.vmem [#allocation14], %s3176_s10  ;;  %s3004_s10 = scalar_lea.sflag [#allocation4], %s4434_s1 }
 0x6b2   : > { %v1908_v35 = vpack.c.bf16 %v1903_v33, %v1900_v30  ;;  %v3446_v41 = vpop.f32.mrb[19].mxu1  ;;  %s3019_s21 = sshll.u32 %s555_s19, 4  ;;  %s4809_s21 = int_to_ptr.vmem [resolvable:$true] %s3019_s21 }
 0x6b3   : > { %v3786_v41 = vld [vmem:[%s4440_s7] sm:$0xff]  ;;  %s3986_s24 = scalar_lea.vmem %s4809_s21, 256 }
 0x6b4   : > { %v1911_v46 = vpack.i.b16 %v1908_v35, %v1907_v28  ;;  %v1914_v47 = vshrl.u32 %v1908_v35, 16  ;;  %p3987_p11 = scmp.ne.s32.totalorder %s4809_s21, %s3986_s24 }
 0x6b6   : > { %v1915_v48 = vpack.i.b16 %v1914_v47, %v1913_v42  ;;  %v1923_v49 = vcombine.high %v1911_v46, %v1918_v39  ;;  %v1930_v5 = vrot.slane %v1911_v46, %v4522_v38  ;;  %p3988_p5 = pnand %p3987_p11, %p4915_p0 }
 0x6b8   : > { %v1937_v50 = vrot.slane %v1923_v49, %v4522_v38  ;;  %v1938_v51 = vcombine.high %v1930_v5, %v4098_v37  ;;  %v1972_v16 = vcombine.high %v1915_v48, %v1918_v39  ;;  %v1979_v21 = vrot.slane %v1915_v48, %v4522_v38  ;;  %v3787_v48 = vld [vmem:[%s4440_s7 + $0x8] sm:$0xff]  ;;  %p3989_p1 = pneg %p3988_p5  ;;  %s4103_s7 = smov [#allocation14]  }
 0x6b9   : > { %v1945_v24 = vrot.slane %v1930_v5, %v4528_v44  ;;  %v3648_v5 = vld [vmem:[#allocation11 + $0x4] ss:$16 sps:$4 sm:$0xff]  }
 0x6ba   : > { %v1952_v52 = vrot.slane %v1938_v51, %v4528_v44  ;;  %v1953_v55 = vcombine.high %v1937_v50, %v4098_v37  ;;  %v1986_v58 = vrot.slane %v1972_v16, %v4522_v38  ;;  %v1987_v59 = vcombine.high %v1979_v21, %v4098_v37  ;;  %v3651_v51 = vld [vmem:[#allocation11 + $0xc] ss:$16 sps:$4 sm:$0xff]   ;;  %v3654_v16 = vld [vmem:[#allocation11 + $0x24] ss:$16 sps:$4 sm:$0xff]   ;;  %2500 = vmatprep.subr.bf16.mxu1 %v3648_v5 }
 0x6bb   : > { %v1960_v60 = vrot.slane %v1937_v50, %v4528_v44  ;;  %v1994_v43 = vrot.slane %v1979_v21, %v4528_v44  ;;  %v3649_v50 = vld [vmem:[#allocation11 + $0x8] ss:$16 sps:$4 sm:$0xff]   ;;  %v3657_v21 = vld [vmem:[#allocation11 + $0x2c] ss:$16 sps:$4 sm:$0xff]   ;;  %2543 = vmatprep.subr.bf16.mxu0 %v3651_v51  ;;  %v3697_v5 = vld [vmem:[#allocation13 + $0x80] sm:$0xff]  }
 0x6bc   : > { %v1967_v61 = vrot.slane %v1953_v55, %v4528_v44  ;;  %v2002_v56 = vcombine.high %v1986_v58, %v4098_v37  ;;  %v2021_v40 = vcombine.low %v1945_v24, %v1952_v52  ;;  %v2001_v62 = vrot.slane %v1987_v59, %v4528_v44  ;;  %v3699_v51 = vld [vmem:[#allocation13 + $0xc8] sm:$0xff]  }
 0x6bd   : > { %v2009_v63 = vrot.slane %v1986_v58, %v4528_v44  ;;  %v3238_v1 = vcombine.high %v1945_v24, %v1952_v52  ;;  %v3652_v24 = vld [vmem:[#allocation11 + $0x20] ss:$16 sps:$4 sm:$0xff]   ;;  %v3655_v52 = vld [vmem:[#allocation11 + $0x28] ss:$16 sps:$4 sm:$0xff]  }
 0x6be   : > { %v2016_v53 = vrot.slane %v2002_v56, %v4528_v44  ;;  %v2028_v54 = vrot.slane %v2021_v40, %v4522_v38  ;;  %v2037_v2 = vcombine.low %v1960_v60, %v1967_v61  ;;  %v3239_v3 = vcombine.high %v1960_v60, %v1967_v61 }
 0x6bf   : > { %v2036_v4 = vrot.slane %v3238_v1, %v4522_v38  ;;  %v2070_v6 = vcombine.low %v1994_v43, %v2001_v62  ;;  %v3240_v7 = vcombine.high %v1994_v43, %v2001_v62  ;;  %v3660_v62 = vld [vmem:[#allocation11 + $0x44] ss:$16 sps:$4 sm:$0xff]   ;;  %v3658_v1 = vld [vmem:[#allocation11 + $0x40] ss:$16 sps:$4 sm:$0xff]  }
 0x6c0   : > { %v2044_v8 = vrot.slane %v2037_v2, %v4522_v38  ;;  %v2052_v9 = vrot.slane %v3239_v3, %v4522_v38  ;;  %v2086_v57 = vcombine.low %v2009_v63, %v2016_v53  ;;  %v3241_v12 = vcombine.high %v2009_v63, %v2016_v53  ;;  %v3663_v63 = vld [vmem:[#allocation11 + $0x4c] ss:$16 sps:$4 sm:$0xff]   ;;  %v3661_v53 = vld [vmem:[#allocation11 + $0x48] ss:$16 sps:$4 sm:$0xff]   ;;  %v3664_v3 = vld [vmem:[#allocation11 + $0x60] ss:$16 sps:$4 sm:$0xff]  }
 0x6c1   : > { %v2077_v34 = vrot.slane %v2070_v6, %v4522_v38  ;;  %v2085_v0 = vrot.slane %v3240_v7, %v4522_v38  ;;  %v2053_v32 = vcombine.low %v2028_v54, %v2036_v4  ;;  %v3666_v54 = vld [vmem:[#allocation11 + $0x64] ss:$16 sps:$4 sm:$0xff]   ;;  %v3669_v2 = vld [vmem:[#allocation11 + $0x6c] ss:$16 sps:$4 sm:$0xff]   ;;  %v3667_v4 = vld [vmem:[#allocation11 + $0x68] ss:$16 sps:$4 sm:$0xff]  }
 0x6c2   : > { %v2061_v10 = vcombine.low %v2044_v8, %v2052_v9  ;;  %v2093_v13 = vrot.slane %v2086_v57, %v4522_v38  ;;  %v2101_v11 = vrot.slane %v3241_v12, %v4522_v38  ;;  %v3672_v6 = vld [vmem:[#allocation11 + $0x84] ss:$16 sps:$4 sm:$0xff]   ;;  %v3675_v7 = vld [vmem:[#allocation11 + $0x8c] ss:$16 sps:$4 sm:$0xff]   ;;  %v3670_v8 = vld [vmem:[#allocation11 + $0x80] ss:$16 sps:$4 sm:$0xff]  }
 0x6c3   : > { %v2102_v18 = vcombine.low %v2077_v34, %v2085_v0  ;;  %v2060_v19 = vrot.slane %v2053_v32, %v4528_v44  ;;  %v3673_v9 = vld [vmem:[#allocation11 + $0x88] ss:$16 sps:$4 sm:$0xff]   ;;  %v3678_v57 = vld [vmem:[#allocation11 + $0xa4] ss:$16 sps:$4 sm:$0xff]   ;;  %v3681_v12 = vld [vmem:[#allocation11 + $0xac] ss:$16 sps:$4 sm:$0xff]  }
 0x6c4   : > { %v2068_v20 = vrot.slane %v2061_v10, %v4528_v44  ;;  %v2110_v45 = vcombine.low %v2093_v13, %v2101_v11  ;;  %v3676_v34 = vld [vmem:[#allocation11 + $0xa0] ss:$16 sps:$4 sm:$0xff]   ;;  %v3679_v0 = vld [vmem:[#allocation11 + $0xa8] ss:$16 sps:$4 sm:$0xff]   ;;  %v3684_v10 = vld [vmem:[#allocation11 + $0xc4] ss:$16 sps:$4 sm:$0xff]  }
 0x6c5   : > { %v2109_v22 = vrot.slane %v2102_v18, %v4528_v44  ;;  %v3682_v32 = vld [vmem:[#allocation11 + $0xc0] ss:$16 sps:$4 sm:$0xff]   ;;  %v3685_v13 = vld [vmem:[#allocation11 + $0xc8] ss:$16 sps:$4 sm:$0xff]   ;;  %v3687_v11 = vld [vmem:[#allocation11 + $0xcc] ss:$16 sps:$4 sm:$0xff]  }
 0x6c6   : > { %v2069_v15 = vcombine.low %v2060_v19, %v2068_v20  ;;  %v2117_v25 = vrot.slane %v2110_v45, %v4528_v44  ;;  %v3690_v18 = vld [vmem:[#allocation11 + $0xe4] ss:$16 sps:$4 sm:$0xff]   ;;  %v3693_v19 = vld [vmem:[#allocation11 + $0xec] ss:$16 sps:$4 sm:$0xff]   ;;  %v3688_v20 = vld [vmem:[#allocation11 + $0xe0] ss:$16 sps:$4 sm:$0xff]  }
 0x6c7   : > { %v3691_v45 = vld [vmem:[#allocation11 + $0xe8] ss:$16 sps:$4 sm:$0xff]  }
 0x6c8   : > { %v2118_v26 = vcombine.low %v2109_v22, %v2117_v25  ;;  %v2122_v23 = vshrl.u32 %v2069_v15, 16 }
 0x6ca   : > { %v2123_v27 = vshrl.u32 %v2118_v26, 16  ;;  %v2121_v28 = vpack.i.b16 %v2118_v26, %v2069_v15 }
 0x6cc   : > { %v2124_v29 = vpack.i.b16 %v2123_v27, %v2122_v23 }
 0x6ce   : > { %2125 = vrot.lane.b32.xlu0 %v2124_v29, %s4100_s20 }
 0x740   : > { %v2126_v38 = vpop.permute.xlu0 %2125 }
 0x741   : > { %v2129_v30 = vsel %vm1677_vm1, %v2121_v28, %v2126_v38  ;;  %v3251_v38 = vld [vmem:[%s4909_s14] ss:$0 sm:$0xff] }
 0x742   : > { %3464 = vmatmul.mubr.bf16.vlgmr.msra.gmra.mrb[4].mxu0 %v2129_v30 }
 0x743   : > { %2575 = vmatprep.mubr.bf16.mxu0 %v4098_v37  ;;  %v3646_v37 = vld [vmem:[#allocation11] ss:$16 sps:$4 sm:$0xff]   ;;  %2544 = vmatpush1.bf16.msra.mxu0 %v3649_v50  ;;  %v3698_v50 = vld [vmem:[#allocation13 + $0x48] sm:$0xff]  }
 0x744   : > { %2501 = vmatpush1.bf16.msra.mxu1 %v3646_v37  ;;  %2545 = vmatprep.subr.bf16.mxu0 %v3657_v21  ;;  %v3696_v37 = vld [vmem:[#allocation13] sm:$0xff]   ;;  %v3701_v21 = vld [vmem:[#allocation13 + $0x88] sm:$0xff]  }
 0x745   : > { %2502 = vmatprep.subr.bf16.mxu1 %v3654_v16  ;;  %v3700_v16 = vld [vmem:[#allocation13 + $0x8] sm:$0xff]  }
 0x747   : > { %2546 = vmatpush1.bf16.msra.mxu0 %v3655_v52  ;;  %v3703_v52 = vld [vmem:[#allocation13 + $0xd0] sm:$0xff]  }
 0x748   : > { %2503 = vmatpush1.bf16.msra.mxu1 %v3652_v24  ;;  %2547 = vmatprep.subr.bf16.mxu0 %v3663_v63  ;;  %v3702_v24 = vld [vmem:[#allocation13 + $0x50] sm:$0xff]   ;;  %v3713_v63 = vld [vmem:[#allocation13 + $0xa0] sm:$0xff]  }
 0x749   : > { %2504 = vmatprep.subr.bf16.mxu1 %v3660_v62  ;;  %v3712_v62 = vld [vmem:[#allocation13 + $0x20] sm:$0xff]  }
 0x74b   : > { %2548 = vmatpush1.bf16.msra.mxu0 %v3661_v53  ;;  %v3715_v53 = vld [vmem:[#allocation13 + $0xe8] sm:$0xff]  }
 0x74c   : > { %2505 = vmatpush1.bf16.msra.mxu1 %v3658_v1  ;;  %2549 = vmatprep.subr.bf16.mxu0 %v3669_v2  ;;  %v3714_v1 = vld [vmem:[#allocation13 + $0x68] sm:$0xff]  }
 0x74d   : > { %2506 = vmatprep.subr.bf16.mxu1 %v3666_v54  ;;  %v3716_v54 = vld [vmem:[#allocation13 + $0x28] sm:$0xff]  }
 0x74e   : > { %v3717_v2 = vld [vmem:[#allocation13 + $0xa8] sm:$0xff]  }
 0x74f   : > { %2550 = vmatpush1.bf16.msra.mxu0 %v3667_v4  ;;  %v3719_v4 = vld [vmem:[#allocation13 + $0xf0] sm:$0xff]  }
 0x750   : > { %2507 = vmatpush1.bf16.msra.mxu1 %v3664_v3  ;;  %2551 = vmatprep.subr.bf16.mxu0 %v3675_v7  ;;  %v3718_v3 = vld [vmem:[#allocation13 + $0x70] sm:$0xff]  }
 0x751   : > { %2508 = vmatprep.subr.bf16.mxu1 %v3672_v6  ;;  %v3720_v6 = vld [vmem:[#allocation13 + $0x30] sm:$0xff]  }
 0x752   : > { %v3721_v7 = vld [vmem:[#allocation13 + $0xb0] sm:$0xff]  }
 0x753   : > { %2552 = vmatpush1.bf16.msra.mxu0 %v3673_v9  ;;  %v3723_v9 = vld [vmem:[#allocation13 + $0xf8] sm:$0xff]  }
 0x754   : > { %2509 = vmatpush1.bf16.msra.mxu1 %v3670_v8  ;;  %2553 = vmatprep.subr.bf16.mxu0 %v3681_v12  ;;  %v3722_v8 = vld [vmem:[#allocation13 + $0x78] sm:$0xff]  }
 0x755   : > { %2510 = vmatprep.subr.bf16.mxu1 %v3678_v57  ;;  %v3724_v57 = vld [vmem:[#allocation13 + $0x38] sm:$0xff]  }
 0x756   : > { %v3725_v12 = vld [vmem:[#allocation13 + $0xb8] sm:$0xff]  }
 0x757   : > { %2554 = vmatpush1.bf16.msra.mxu0 %v3679_v0  ;;  %v2318_v0 = vld [vmem:[%s4911_s15] sm:$0xf]  ;;  %s3990_s15 = sshll.u32 %s4103_s7, 4  ;;  %s3991_s15 = int_to_ptr.vmem [resolvable:$false] %s3990_s15 }
 0x758   : > { %2511 = vmatpush1.bf16.msra.mxu1 %v3676_v34  ;;  %2555 = vmatprep.subr.bf16.mxu0 %v3687_v11  ;;  %v2330_v34 = vsub.s32 2, %v4497_v14  ;;  %v2327_v11 = vrot.slane %v2318_v0, %v674_v36  ;;  %s3992_s16 = scalar_lea.vmem %s3991_s15, 512  ;;  %p3993_p10 = scmp.lt.s32.totalorder %s4809_s21, %s3991_s15 }
 0x759   : > { %2512 = vmatprep.subr.bf16.mxu1 %v3684_v10  ;;  %v2323_v10 = vrot.slane %v2318_v0, %v4506_v17  ;;  %p3994_p13 = scmp.lt.s32.totalorder %s3992_s16, %s3986_s24 }
 0x75b   : > { %2556 = vmatpush1.bf16.msra.mxu0 %v3685_v13  ;;  %v2331_v13 = vrot.slane %v2318_v0, %v2330_v34  ;;  %p3995_p2 = por %p3994_p13, %p3993_p10 }
 0x75c   : > { %2513 = vmatpush1.bf16.msra.mxu1 %v3682_v32  ;;  %2557 = vmatprep.subr.bf16.mxu0 %v3693_v19  ;;  %v2334_v32 = vsub.s32 3, %v4497_v14 }
 0x75d   : > { %2514 = vmatprep.subr.bf16.mxu1 %v3690_v18  ;;  %p3996_p8 = pnand %p3995_p2, %p3989_p1 }
 0x75e   : > { %v2335_v18 = vrot.slane %v2318_v0, %v2334_v32 }
 0x75f   : > { %2558 = vmatpush1.bf16.msra.mxu0 %v3691_v45 }
 0x760   : > { %2515 = vmatpush1.bf16.msra.mxu1 %v3688_v20 }
 0x815   : > { %v2236_v44 = vpop.f32.mrb[4].mxu0 }
 0x816   : > { %v2237_v33 = vadd.f32 %v3242_v31, %v2236_v44  ;;  %v3465_v35 = vpop.f32.mrb[5].mxu0 }
 0x817   : > { %v2239_v39 = vpop.f32.mrb[6].mxu0 }
 0x818   : > { %v4753_v42 = vadd.f32 %v3786_v41, %v2237_v33  ;;  %v2240_v46 = vadd.f32 %v3242_v31, %v2239_v39  ;;  %v3466_v47 = vpop.f32.mrb[7].mxu0  ;;  %v3252_v33 = vld [vmem:[%s4910_s23] ss:$0 sm:$0xff]  ;;  %s4814_s23 = scalar_lea.hbm %s4914_s12, %s3332_s17 }
 0x819   : > { %v3694_v47 = vld [vmem:[#allocation13 + $0x40] sm:$0xff]  }
 0x81a   : > { %2247 = vadd.xlane.f32.xlu1 %v4753_v42  ;;  %v4757_v49 = vadd.f32 %v3787_v48, %v2240_v46  ;;  %v3695_v48 = vld [vmem:[#allocation13 + $0xc0] sm:$0xff]   ;;  %3359 = vmatprep.subr.bf16.mxu1 %v3694_v47 }
 0x81b   : > { %3381 = vmatprep.subr.bf16.mxu0 %v3695_v48 }
 0x81e   : > { %2249 = vadd.xlane.f32.xlu1 %v4757_v49 }
 0x8a7   : > { %v2248_v55 = vpop.xlane.xlu1 %2247 }
 0x8a8   : > { %v2251_v58 = vmul.f32 0.0078125, %v2248_v55  ;;  %v3704_v55 = vld [vmem:[#allocation13 + $0x10] sm:$0xff]  }
 0x8aa   : > { %v4761_v59 = vsub.f32 %v4753_v42, %v2251_v58  ;;  %v3705_v58 = vld [vmem:[#allocation13 + $0x90] sm:$0xff]  }
 0x8ab   : > { %v2250_v60 = vpop.xlane.xlu1 %2249 }
 0x8ac   : > { %v2252_v61 = vmul.f32 0.0078125, %v2250_v60  ;;  %v2255_v56 = vmul.f32 %v4761_v59, %v4761_v59  ;;  %v3707_v60 = vld [vmem:[#allocation13 + $0xd8] sm:$0xff]  }
 0x8ae   : > { %v4766_v40 = vsub.f32 %v4757_v49, %v2252_v61  ;;  %2257 = vadd.xlane.f32.xlu1 %v2255_v56  ;;  %v3708_v61 = vld [vmem:[#allocation13 + $0x18] sm:$0xff]  }
 0x8af   : > { %v3709_v56 = vld [vmem:[#allocation13 + $0x98] sm:$0xff]  }
 0x8b0   : > { %v2256_v43 = vmul.f32 %v4766_v40, %v4766_v40 }
 0x8b2   : > { %2259 = vadd.xlane.f32.xlu1 %v2256_v43  ;;  %v3711_v43 = vld [vmem:[#allocation13 + $0xe0] sm:$0xff]  }
 0x93b   : > { %v2258_v15 = vpop.xlane.xlu1 %2257 }
 0x93c   : > { %v2261_v22 = vmul.f32 0.0078125, %v2258_v15 }
 0x93e   : > { %v2263_v25 = vadd.f32 1e-05, %v2261_v22 }
 0x93f   : > { %v2260_v26 = vpop.xlane.xlu1 %2259 }
 0x940   : > { %3750 = vrsqrt.f32 %v2263_v25  ;;  %v2262_v23 = vmul.f32 0.0078125, %v2260_v26 }
 0x942   : > { %v2264_v27 = vadd.f32 1e-05, %v2262_v23 }
 0x944   : > { %3752 = vrsqrt.f32 %v2264_v27 }
 0x94a   : > { %v3751_v28 = vpop.eup %3750 }
 0x94b   : > { %v2267_v29 = vmul.f32 %v3751_v28, %v4761_v59  ;;  %v3706_v59 = vld [vmem:[#allocation13 + $0x58] sm:$0xff]  }
 0x94d   : > { %v2275_v44 = vmul.f32 %v3251_v38, %v2267_v29 }
 0x94e   : > { %v3753_v30 = vpop.eup %3752 }
 0x94f   : > { %v2268_v31 = vmul.f32 %v3753_v30, %v4766_v40  ;;  %v2283_v39 = vadd.f32 %v3252_v33, %v2275_v44  ;;  %v3710_v40 = vld [vmem:[#allocation13 + $0x60] sm:$0xff]  }
 0x951   : > { %v2276_v35 = vmul.f32 %v3251_v38, %v2268_v31 }
 0x953   : > { %v2284_v41 = vadd.f32 %v3252_v33, %v2276_v35 }
 0x955   : > { %v2285_v46 = vpack.c.bf16 %v2284_v41, %v2283_v39 }
 0x957   : > { %2533 = vmatmul.mubr.bf16.vlgmr.msra.gmra.mrb[20].mxu1 %v2285_v46  ;;  %2576 = vmatmul.mubr.bf16.vlgmr.msra.gmra.mrb[8].mxu0 %v2285_v46 }
 0x958   : > { %3360 = vmatpush3.bf16.msra.mxu1 %v3696_v37  ;;  %3382 = vmatpush3.bf16.msra.mxu0 %v3697_v5 }
 0x959   : > { %3361 = vmatprep.subr.bf16.mxu1 %v3698_v50  ;;  %3383 = vmatprep.subr.bf16.mxu0 %v3699_v51 }
 0x95c   : > { %3362 = vmatpush3.bf16.msra.mxu1 %v3700_v16  ;;  %3384 = vmatpush3.bf16.msra.mxu0 %v3701_v21 }
 0x95d   : > { %3363 = vmatprep.subr.bf16.mxu1 %v3702_v24  ;;  %3385 = vmatprep.subr.bf16.mxu0 %v3703_v52 }
 0x960   : > { %3364 = vmatpush3.bf16.msra.mxu1 %v3704_v55  ;;  %3386 = vmatpush3.bf16.msra.mxu0 %v3705_v58 }
 0x961   : > { %3365 = vmatprep.subr.bf16.mxu1 %v3706_v59  ;;  %3387 = vmatprep.subr.bf16.mxu0 %v3707_v60 }
 0x964   : > { %3366 = vmatpush3.bf16.msra.mxu1 %v3708_v61  ;;  %3388 = vmatpush3.bf16.msra.mxu0 %v3709_v56 }
 0x965   : > { %3367 = vmatprep.subr.bf16.mxu1 %v3710_v40  ;;  %3389 = vmatprep.subr.bf16.mxu0 %v3711_v43 }
 0x968   : > { %3368 = vmatpush3.bf16.msra.mxu1 %v3712_v62  ;;  %3390 = vmatpush3.bf16.msra.mxu0 %v3713_v63 }
 0x969   : > { %3369 = vmatprep.subr.bf16.mxu1 %v3714_v1  ;;  %3391 = vmatprep.subr.bf16.mxu0 %v3715_v53 }
 0x96c   : > { %3370 = vmatpush3.bf16.msra.mxu1 %v3716_v54  ;;  %3392 = vmatpush3.bf16.msra.mxu0 %v3717_v2 }
 0x96d   : > { %3371 = vmatprep.subr.bf16.mxu1 %v3718_v3  ;;  %3393 = vmatprep.subr.bf16.mxu0 %v3719_v4 }
 0x970   : > { %3372 = vmatpush3.bf16.msra.mxu1 %v3720_v6  ;;  %3394 = vmatpush3.bf16.msra.mxu0 %v3721_v7 }
 0x971   : > { %3373 = vmatprep.subr.bf16.mxu1 %v3722_v8  ;;  %3395 = vmatprep.subr.bf16.mxu0 %v3723_v9 }
 0x974   : > { %3374 = vmatpush3.bf16.msra.mxu1 %v3724_v57  ;;  %3396 = vmatpush3.bf16.msra.mxu0 %v3725_v12 }
 0xa2a   : > { %v2534_v19 = vpop.f32.mrb[20].mxu1  ;;  %v2577_v20 = vpop.f32.mrb[8].mxu0 }
 0xa2b   : > { %v4786_v45 = vadd.f32 %v2534_v19, %v2323_v10  ;;  %v4788_v15 = vadd.f32 %v2577_v20, %v2331_v13  ;;  %v2536_v22 = vpop.f32.mrb[21].mxu1  ;;  %v2579_v25 = vpop.f32.mrb[9].mxu0 }
 0xa2c   : > { %v4790_v26 = vadd.f32 %v2536_v22, %v2327_v11  ;;  %v4792_v23 = vadd.f32 %v2579_v25, %v2335_v18  ;;  %v2538_v27 = vpop.f32.mrb[22].mxu1  ;;  %v2581_v28 = vpop.f32.mrb[10].mxu0 }
 0xa2d   : > { %v3285_v17 = vmul.f32 -1.702, %v4786_v45  ;;  %v3287_v14 = vmul.f32 -1.702, %v4788_v15  ;;  %v2539_v36 = vadd.f32 %v2538_v27, %v2323_v10  ;;  %v2582_v29 = vadd.f32 %v2581_v28, %v2331_v13  ;;  %v2540_v38 = vpop.f32.mrb[23].mxu1  ;;  %v2583_v30 = vpop.f32.mrb[11].mxu0 }
 0xa2e   : > { %v3286_v31 = vmul.f32 -1.702, %v4790_v26  ;;  %v3288_v44 = vmul.f32 -1.702, %v4792_v23  ;;  %v2541_v33 = vadd.f32 %v2540_v38, %v2327_v11  ;;  %v2584_v35 = vadd.f32 %v2583_v30, %v2335_v18 }
 0xa2f   : > { %v2602_v39 = vmul.f32 1.442695, %v3285_v17  ;;  %v2606_v41 = vmul.f32 1.442695, %v3287_v14  ;;  %v3289_v46 = vmul.f32 -1.702, %v2539_v36 }
 0xa30   : > { %v2604_v47 = vmul.f32 1.442695, %v3286_v31  ;;  %v2608_v48 = vmul.f32 1.442695, %v3288_v44  ;;  %v3291_v37 = vmul.f32 -1.702, %v2582_v29 }
 0xa31   : > { %3754 = vpow2.f32 %v2602_v39  ;;  %v2610_v5 = vmul.f32 1.442695, %v3289_v46  ;;  %v3290_v50 = vmul.f32 -1.702, %v2541_v33  ;;  %v3292_v51 = vmul.f32 -1.702, %v2584_v35 }
 0xa32   : > { %3756 = vpow2.f32 %v2606_v41  ;;  %v2614_v16 = vmul.f32 1.442695, %v3291_v37 }
 0xa33   : > { %3758 = vpow2.f32 %v2604_v47  ;;  %v2612_v21 = vmul.f32 1.442695, %v3290_v50  ;;  %v2616_v24 = vmul.f32 1.442695, %v3292_v51 }
 0xa34   : > { %3760 = vpow2.f32 %v2608_v48 }
 0xa35   : > { %3762 = vpow2.f32 %v2610_v5 }
 0xa36   : > { %3764 = vpow2.f32 %v2614_v16 }
 0xa37   : > { %3766 = vpow2.f32 %v2612_v21 }
 0xa38   : > { %3768 = vpow2.f32 %v2616_v24 }
 0xa3b   : > { %v3755_v52 = vpop.eup %3754 }
 0xa3c   : > { %v3757_v55 = vpop.eup %3756  ;;  %v2618_v58 = vadd.f32 1.0, %v3755_v52 }
 0xa3d   : > { %v3759_v59 = vpop.eup %3758  ;;  %v2620_v60 = vadd.f32 1.0, %v3757_v55 }
 0xa3e   : > { %v3761_v61 = vpop.eup %3760  ;;  %3770 = vrcp.f32 %v2618_v58  ;;  %v2619_v56 = vadd.f32 1.0, %v3759_v59 }
 0xa3f   : > { %v3763_v40 = vpop.eup %3762  ;;  %3772 = vrcp.f32 %v2620_v60  ;;  %v2621_v43 = vadd.f32 1.0, %v3761_v61 }
 0xa40   : > { %v3765_v62 = vpop.eup %3764  ;;  %3774 = vrcp.f32 %v2619_v56  ;;  %v2622_v63 = vadd.f32 1.0, %v3763_v40 }
 0xa41   : > { %v3767_v1 = vpop.eup %3766  ;;  %3776 = vrcp.f32 %v2621_v43  ;;  %v2624_v53 = vadd.f32 1.0, %v3765_v62 }
 0xa42   : > { %v3769_v54 = vpop.eup %3768  ;;  %3778 = vrcp.f32 %v2622_v63  ;;  %v2623_v2 = vadd.f32 1.0, %v3767_v1 }
 0xa43   : > { %3780 = vrcp.f32 %v2624_v53  ;;  %v2625_v3 = vadd.f32 1.0, %v3769_v54 }
 0xa44   : > { %3782 = vrcp.f32 %v2623_v2 }
 0xa45   : > { %3784 = vrcp.f32 %v2625_v3 }
 0xa48   : > { %v3771_v4 = vpop.eup %3770 }
 0xa49   : > { %v3773_v6 = vpop.eup %3772  ;;  %v2642_v12 = vmul.f32 %v3771_v4, %v4786_v45 }
 0xa4a   : > { %v3775_v7 = vpop.eup %3774  ;;  %v2644_v32 = vmul.f32 %v3773_v6, %v4788_v15  ;;  %v3293_v15 = vld [vmem:[%s4912_s22] ss:$0 sm:$0xff] }
 0xa4b   : > { %v3777_v8 = vpop.eup %3776  ;;  %v2643_v11 = vmul.f32 %v3775_v7, %v4790_v26 }
 0xa4c   : > { %v3779_v9 = vpop.eup %3778  ;;  %v2645_v20 = vmul.f32 %v3777_v8, %v4792_v23 }
 0xa4d   : > { %v3781_v57 = vpop.eup %3780  ;;  %v2646_v34 = vmul.f32 %v3779_v9, %v2539_v36 }
 0xa4e   : > { %v3783_v0 = vpop.eup %3782  ;;  %v2648_v10 = vmul.f32 %v3781_v57, %v2582_v29 }
 0xa4f   : > { %v3785_v13 = vpop.eup %3784  ;;  %v2650_v18 = vpack.c.bf16 %v2646_v34, %v2642_v12  ;;  %v2647_v19 = vmul.f32 %v3783_v0, %v2541_v33 }
 0xa50   : > { %v2652_v22 = vpack.c.bf16 %v2648_v10, %v2644_v32  ;;  %v2649_v25 = vmul.f32 %v3785_v13, %v2584_v35 }
 0xa51   : > { %v2651_v27 = vpack.c.bf16 %v2647_v19, %v2643_v11 }
 0xa52   : > { %v2653_v28 = vpack.c.bf16 %v2649_v25, %v2645_v20 }
 0xa53   : > { %2949 = vmatprep.mubr.bf16.mxu1 %v2651_v27 }
 0xa54   : > { %2990 = vmatprep.mubr.bf16.mxu0 %v2653_v28  ;;  %2950 = vmatmul.mubr.bf16.vlgmr.msra.gmra.mrb[24].mxu1 %v2650_v18 }
 0xa55   : > { %2991 = vmatmul.mubr.bf16.vlgmr.msra.gmra.mrb[12].mxu0 %v2652_v22 }
 0xb27   : > { %v3375_v45 = vpop.f32.mrb[24].mxu1 }
 0xb28   : > { %v3397_v17 = vpop.f32.mrb[12].mxu0  ;;  %v3376_v26 = vpop.f32.mrb[25].mxu1 }
 0xb29   : > { %v3377_v14 = vadd.f32 %v3376_v26, %v3375_v45  ;;  %v3398_v36 = vpop.f32.mrb[13].mxu0  ;;  %v3378_v23 = vpop.f32.mrb[26].mxu1 }
 0xb2a   : > { %v3399_v29 = vadd.f32 %v3398_v36, %v3397_v17  ;;  %v3400_v38 = vpop.f32.mrb[14].mxu0  ;;  %v3379_v30 = vpop.f32.mrb[27].mxu1 }
 0xb2b   : > { %v2952_v31 = vadd.f32 %v3377_v14, %v3293_v15  ;;  %v3380_v44 = vadd.f32 %v3379_v30, %v3378_v23  ;;  %v3401_v33 = vpop.f32.mrb[15].mxu0 }
 0xb2c   : > { %v3402_v35 = vadd.f32 %v3401_v33, %v3400_v38 }
 0xb2d   : > { %v2993_v39 = vadd.f32 %v3399_v29, %v2952_v31  ;;  %v2955_v41 = vadd.f32 %v3380_v44, %v3293_v15 }
 0xb2f   : > { %v2999_v46 = vadd.f32 %v2993_v39, %v4753_v42  ;;  %v2996_v47 = vadd.f32 %v3402_v35, %v2955_v41 }
 0xb31   : > { %3001 = vst [vmem:[%s555_s19] sm:$0xff] %v2999_v46  ;;  %v3000_v48 = vadd.f32 %v2996_v47, %v4757_v49 }
 0xb33   : > { %3002 = vst [vmem:[%s555_s19 + $0x8] sm:$0xff] %v3000_v48 }
 0xb34   : > { %3999 = shalt.err (!%p3996_p8)
}
 0xb35   : > { %s4000_s20 = scalar_lea.hbm %s4814_s23, 256  ;;  %s4004_s19 = scalar_lea.hbm %s4914_s12, 512 }
 0xb36   : > { %p4001_p9 = scmp.ne.s32.totalorder %s4814_s23, %s4000_s20  ;;  %p4005_p3 = scmp.lt.u32.totalorder %s4814_s23, %s4914_s12 }
 0xb37   : > { %p4006_p7 = scmp.lt.u32.totalorder %s4004_s19, %s4000_s20  ;;  %p4008_p11 = scmp.lt.u32.totalorder %s4000_s20, %s4814_s23 }
 0xb38   : > { %p4002_p4 = pnand %p4001_p9, %p4915_p0 }
 0xb39   : > { %p4007_p12 = por %p4006_p7, %p4005_p3 }
 0xb3a   : > { %p4003_p6 = pneg %p4002_p4 }
 0xb3b   : > { %p4009_p5 = por %p4008_p11, %p4007_p12 }
 0xb3d   : > { %p4010_p1 = pnand %p4009_p5, %p4003_p6 }
 0xb3f   : > { %4013 = shalt.err (!%p4010_p1)
}
 0xb40   : > { %s4104_s18 = smov 128   ;;  %s4105_s24 = smov 8  }
 0xb41   : > { %3493 = dma.vmem_to_hbm [thread:$0]  (%p4915_p0), %s4809_s21, 256, %s4814_s23, %s3004_s10, %s4104_s18, %s4104_s18, %s4105_s24  }
 0xb42 PF: > { %s3034_s7 = sand.u32 1, %s4060_s25   ;;  %p4916_p10 = scmp.ne.s32.totalorder %s4904_s6, 0 }
 0xb43   : > { %p4917_p13 = scmp.ge.s32.totalorder %s4080_s30, 2  ;;  %s3035_s15 = scalar_lea.sflag [#allocation4], %s3034_s7 }
 0xb45   : > { %p3519_p2 = pnand %p4917_p13, %p4916_p10 }
 0xb47   : > { %4055 = dma.done.wait (!%p3519_p2), %s3035_s15, 256  }
 0xb48   : > { %4057 = vsyncadd (!%p3519_p2), %s3035_s15, 4294967040  ;;  %s32_s30 = sadd.s32 1, %s4080_s30   ;;  %s4918_s3 = smov %s4925_s28 }
 0xb49   : > { %p29_p8 = scmp.ge.s32.totalorder %s32_s30, 4   ;;  %s4919_s25 = smov %s4064_s26 }
 0xb4a   : > { %s4920_s26 = smov %s4068_s27  ;;  %s4921_s27 = smov %s4381_s8 }
 0xb4b   : > { %s4922_s28 = smov %s4076_s29  ;;  %s4923_s29 = smov %s4918_s3 }
 0xb4c   :  { %31 = sbr.rel (!%p29_p8) target bundleno = 18 (0x12), region = 142 }
 0xb53   :  { %3040 = vsyncpa [#allocation3], 1 }
 0xb54   :  { %3042 = vsyncpa [#allocation3 + $0x1], 1 }
 0xb55   :  { %3043 = vsyncpa [#allocation6], 1 }
 0xb56   :  { %3044 = vsyncpa [#allocation9], 1 }
 0xb57   :  { %3045 = vsyncpa [#allocation12], 1 }
 0xb58   :  { %3046 = vsyncpa [#allocation4], 1 }
 0xb59   :  { %3048 = vsyncpa [#allocation4 + $0x1], 1 }

</bundles_post_ra>
